<compile_context>
chip_gen: v5e
topology: v5e:2x2
jax: 0.10.0
libtpu: 0.0.40
codegen_flags: <defaults>
</compile_context>

<pallas_src>
import jax
import jax.numpy as jnp
from jax import lax
from jax.experimental import pallas as pl
from jax.experimental.pallas import tpu as pltpu


def _round_up(x, m):
    return ((x + m - 1) // m) * m


def prepare_params(params, weights_dtype=jnp.float32):
    """One-time parameter prep: pre-sum gate biases, lane-pad the output head.

    weights_dtype: float32 for bit-accurate validation.  On v6e/v7x cast the
    three weight matrices to bfloat16 to halve weight DMA/VMEM (MXU accumulates
    in f32 via preferred_element_type); keep activations f32 on v5e (no bf16 VPU/EUP).
    """
    H = params["w_hh"].shape[0]
    out_dim = params["w_out"].shape[1]                      # 5*M + M + 3
    out_pad = _round_up(max(out_dim, 128), 128)
    w_out_p = jnp.zeros((H, out_pad), jnp.float32).at[:, :out_dim].set(params["w_out"])
    b_out_p = jnp.zeros((1, out_pad), jnp.float32).at[:, :out_dim].set(params["b_out"])
    return {
        "w_ih": params["w_ih"].astype(weights_dtype),        # (IN, 4H)
        "w_hh": params["w_hh"].astype(weights_dtype),        # (H, 4H)
        "b_gates": (params["b_ih"] + params["b_hh"]).astype(jnp.float32),  # (1, 4H)
        "w_out": w_out_p.astype(weights_dtype),               # (H, OUT_PAD)
        "b_out": b_out_p,                                     # (1, OUT_PAD)
        "out_dim": out_dim,
    }
    # TODO(synk): at production sizes use weights_dtype=jnp.bfloat16 (v6e/v7x) and add a
    # batch-parallel leading grid axis (dimension_semantics=("parallel","arbitrary"))
    # so v7x's two TensorCores each run half the batch.


def _make_kernel(T, Tc, B_pad, H, OUT_PAD, M, aligned):
    """Build the chunked recurrence kernel (all sizes are static Python ints)."""
    R = Tc * B_pad  # rows per chunk

    def kernel(inp_ref, cell0_ref, hid0_ref,
               w_ih_ref, w_hh_ref, b_g_ref, w_out_ref, b_out_ref,
               cell_ref, hid_ref, head_ref, xp_scr, hid_scr):
        c = pl.program_id(0)

        # Seed the carried state from the initial state on the first chunk.
        # cell_ref / hid_ref have a constant output block index, so they stay
        # resident in VMEM across the whole grid (accumulator pattern).
        @pl.when(c == 0)
        def _():
            cell_ref[...] = cell0_ref[...]
            hid_ref[...] = hid0_ref[...]

        # Batched input projection for the whole chunk (one MXU pass, bias
        # pre-summed) -- off the serial recurrence chain.
        xp_scr[...] = (jnp.dot(inp_ref[...], w_ih_ref[...],
                               preferred_element_type=jnp.float32) + b_g_ref[...])

        w_hh = w_hh_ref[...]   # resident for the whole chunk

        def step(t, carry):
            cell, hidden = carry
            start = t * B_pad
            if not isinstance(start, int):
                start = pl.multiple_of(start, B_pad)
            # ---- custom LSTM cell: exactly one matmul on the serial chain ----
            gates = (xp_scr[pl.ds(start, B_pad), :]
                     + jnp.dot(hidden, w_hh, preferred_element_type=jnp.float32))
            if H % 128 == 0:
                # lane-aligned slices: sigmoid only on i/f/o, tanh only on c
                i_g = jax.nn.sigmoid(gates[:, 0 * H:1 * H])
                f_g = jax.nn.sigmoid(gates[:, 1 * H:2 * H])
                c_g = jnp.tanh(gates[:, 2 * H:3 * H])
                o_g = jax.nn.sigmoid(gates[:, 3 * H:4 * H])
            else:
                # at small H the whole (B, 4H) gate vector is one vreg row:
                # full-width sigmoid + tanh is the cheapest form
                sig = jax.nn.sigmoid(gates)
                tnh = jnp.tanh(gates)
                i_g, f_g = sig[:, 0 * H:1 * H], sig[:, 1 * H:2 * H]
                c_g, o_g = tnh[:, 2 * H:3 * H], sig[:, 3 * H:4 * H]
            cell = f_g * cell + i_g * c_g
            hidden = o_g * cell                  # NOTE: reference uses o*cell (no tanh)
            hid_scr[pl.ds(start, B_pad), :] = hidden
            return (cell, hidden)

        carry = (cell_ref[...], hid_ref[...])
        if aligned:
            if Tc <= 32:
                for t in range(Tc):              # full unroll, LLO sees everything
                    carry = step(t, carry)
            else:
                carry = lax.fori_loop(0, Tc, step, carry, unroll=4)
        else:
            # ragged last chunk: only run the valid steps so padded timesteps
            # never touch the carried (cell, hidden)
            n_valid = jnp.minimum(jnp.int32(Tc), jnp.int32(T) - c * Tc)

            @pl.when(n_valid < Tc)
            def _():
                hid_scr[...] = jnp.zeros_like(hid_scr)   # keep tail rows finite

            carry = lax.fori_loop(0, n_valid, step, carry)

        cell, hidden = carry
        cell_ref[...] = cell
        hid_ref[...] = hidden

        # ---- decoder head for the whole chunk: one batched MXU pass + one
        #      lane-masked activation pass into the lane-dense output slab ----
        out = (jnp.dot(hid_scr[...], w_out_ref[...],
                       preferred_element_type=jnp.float32) + b_out_ref[...])
        col = lax.broadcasted_iota(jnp.int32, (R, OUT_PAD), 1)
        is_var = (col >= 2 * M) & (col < 4 * M)
        is_corr = (col >= 4 * M) & (col < 5 * M)
        is_wsm = (col >= 5 * M) & (col < 6 * M)
        is_psm = (col >= 6 * M) & (col < 6 * M + 3)
        is_sm = is_wsm | is_psm
        is_pad = col >= 6 * M + 3
        neg = jnp.float32(-1e30)
        w_max = jnp.max(jnp.where(is_wsm, out, neg), axis=-1, keepdims=True)
        p_max = jnp.max(jnp.where(is_psm, out, neg), axis=-1, keepdims=True)
        shift = jnp.where(is_wsm, w_max, jnp.where(is_psm, p_max, 0.0))
        e = jnp.exp(out - shift)    # exp(logvar) on var lanes, exp(x-max) on softmax lanes
        w_sum = jnp.sum(jnp.where(is_wsm, e, 0.0), axis=-1, keepdims=True)
        p_sum = jnp.sum(jnp.where(is_psm, e, 0.0), axis=-1, keepdims=True)
        # exact reciprocal: approx=True (EUP vrcp) is ~1e-4 rel error, right at
        # our validation tolerance, and the head is off the hot loop anyway
        inv = jnp.where(is_wsm, pl.reciprocal(w_sum), pl.reciprocal(p_sum))
        head = out                                       # meanx / meany lanes
        head = jnp.where(is_var, e, head)                # varx / vary
        head = jnp.where(is_corr, 0.9 * jnp.tanh(out), head)  # correlation
        head = jnp.where(is_sm, e * inv + 1e-5, head)    # weights / pen softmax (+1e-5)
        head = jnp.where(is_pad, 0.0, head)              # zero the padding lanes
        head_ref[...] = head

    return kernel


def sketchrnn_forward_seq(inp_seq, cell0, hidden0, prepped, M, *,
                          t_chunk=None, vmem_chunk_budget=8 * 1024 * 1024):
    """Run the full recurrence (T steps) as one T-chunked Pallas kernel.

    inp_seq: (T, B, IN); cell0/hidden0: (B, H).
    Returns ((cell_T, hidden_T), (meanx, meany, varx, vary, corr, weights, pen))
    where each head is (T, B, *).
    """
    T, B, IN = inp_seq.shape
    H = cell0.shape[1]
    OUT_PAD = prepped["w_out"].shape[1]
    B_pad = max(8, _round_up(B, 8))

    if t_chunk is None:
        # Size the T-chunk so the per-chunk working set (double-buffered input
        # + head blocks, xp + hidden scratch; all f32, lane-padded widths) fits
        # the budget.  8 MiB is conservative even for v5e's 16 MiB scoped VMEM
        # and v7x's 64 MiB physical VMEM.
        bytes_per_step = 4 * B_pad * (2 * _round_up(IN, 128)    # input block (x2 buffers)
                                      + 2 * OUT_PAD             # head block  (x2 buffers)
                                      + _round_up(4 * H, 128)   # xp scratch
                                      + _round_up(H, 128))      # hidden scratch
        t_chunk = max(1, min(T, vmem_chunk_budget // bytes_per_step))
    Tc = int(t_chunk)
    num_chunks = pl.cdiv(T, Tc)
    T_pad = num_chunks * Tc
    aligned = (T_pad == T)

    if B_pad != B:
        inp_seq = jnp.pad(inp_seq, ((0, 0), (0, B_pad - B), (0, 0)))
        cell0 = jnp.pad(cell0, ((0, B_pad - B), (0, 0)))
        hidden0 = jnp.pad(hidden0, ((0, B_pad - B), (0, 0)))
    if T_pad != T:
        inp_seq = jnp.pad(inp_seq, ((0, T_pad - T), (0, 0), (0, 0)))
    inp2d = inp_seq.reshape(T_pad * B_pad, IN)   # 2-D so the chunk matmul needs no in-kernel reshape

    kernel = _make_kernel(T, Tc, B_pad, H, OUT_PAD, M, aligned)
    R = Tc * B_pad

    def full2d(arr):
        return pl.BlockSpec(arr.shape, lambda c: (0, 0))

    grid_spec = pltpu.PrefetchScalarGridSpec(
        num_scalar_prefetch=0,
        grid=(num_chunks,),
        in_specs=[
            pl.BlockSpec((R, IN), lambda c: (c, 0)),        # per-chunk input rows
            full2d(cell0), full2d(hidden0),                 # initial state (chunk 0 only)
            full2d(prepped["w_ih"]), full2d(prepped["w_hh"]),
            full2d(prepped["b_gates"]),
            full2d(prepped["w_out"]), full2d(prepped["b_out"]),
        ],
        out_specs=(
            pl.BlockSpec((B_pad, H), lambda c: (0, 0)),     # carried cell  (resident)
            pl.BlockSpec((B_pad, H), lambda c: (0, 0)),     # carried hidden (resident)
            pl.BlockSpec((R, OUT_PAD), lambda c: (c, 0)),   # per-chunk head slab
        ),
        scratch_shapes=[
            pltpu.VMEM((R, 4 * H), jnp.float32),            # xp for this chunk
            pltpu.VMEM((R, H), jnp.float32),                # hiddens for this chunk
        ],
    )

    cell_o, hid_o, head2d = pl.pallas_call(
        kernel,
        out_shape=(
            jax.ShapeDtypeStruct((B_pad, H), jnp.float32),
            jax.ShapeDtypeStruct((B_pad, H), jnp.float32),
            jax.ShapeDtypeStruct((T_pad * B_pad, OUT_PAD), jnp.float32),
        ),
        grid_spec=grid_spec,
        compiler_params=pltpu.CompilerParams(
            dimension_semantics=("arbitrary",),     # T-chunks carry state -> serial axis
            vmem_limit_bytes=48 * 1024 * 1024,
        ),
    )(inp2d, cell0, hidden0,
      prepped["w_ih"], prepped["w_hh"], prepped["b_gates"],
      prepped["w_out"], prepped["b_out"])

    # Slice the lane-dense slab back into the 7 logical views (JAX level, cheap).
    cell_o = cell_o[:B]
    hid_o = hid_o[:B]
    head = head2d.reshape(T_pad, B_pad, OUT_PAD)[:T, :B, :]
    meanx = head[..., 0 * M:1 * M]
    meany = head[..., 1 * M:2 * M]
    varx = head[..., 2 * M:3 * M]
    vary = head[..., 3 * M:4 * M]
    corr = head[..., 4 * M:5 * M]
    weights = head[..., 5 * M:6 * M]
    pen = head[..., 6 * M:6 * M + 3]
    return (cell_o, hid_o), (meanx, meany, varx, vary, corr, weights, pen)


def sketchrnn_forward(inp, state, prepped, M):
    """Single-step forward with the exact semantics of SketchRNNUnconditional.forward."""
    # TODO(synk): for autoregressive decode, run the generation loop inside one kernel
    # (or keep state/weights resident via input_output_aliases + cross-call prefetch)
    # instead of paying a full pallas_call + weight DMA per generated point.
    cell, hidden = state
    (cell_n, hid_n), heads = sketchrnn_forward_seq(inp[None], cell, hidden, prepped, M)
    return ((cell_n, hid_n),) + tuple(h[0] for h in heads)


if __name__ == "__main__":
    # Small shapes consistent with the module: sketch-rnn stroke input dim 5.
    B, INPUT_SIZE, HIDDEN_SIZE, M, T = 2, 5, 32, 8, 8
    OUT_DIM = 5 * M + M + 3  # 51

    key = jax.random.PRNGKey(0)
    ks = jax.random.split(key, 8)

    def init(k, shape, fan_in):
        bound = 1.0 / jnp.sqrt(fan_in)
        return jax.random.uniform(k, shape, jnp.float32, -bound, bound)

    params = {
        # stored transposed: [in_features, out_features]
        "w_ih": init(ks[0], (INPUT_SIZE, 4 * HIDDEN_SIZE), INPUT_SIZE),
        "b_ih": init(ks[1], (1, 4 * HIDDEN_SIZE), INPUT_SIZE),
        "w_hh": init(ks[2], (HIDDEN_SIZE, 4 * HIDDEN_SIZE), HIDDEN_SIZE),
        "b_hh": init(ks[3], (1, 4 * HIDDEN_SIZE), HIDDEN_SIZE),
        "w_out": init(ks[4], (HIDDEN_SIZE, OUT_DIM), HIDDEN_SIZE),
        "b_out": init(ks[5], (1, OUT_DIM), HIDDEN_SIZE),
    }
    prepped = prepare_params(params)

    inp_seq = jax.random.normal(ks[6], (T, B, INPUT_SIZE), jnp.float32)
    cell0 = jnp.zeros((B, HIDDEN_SIZE), jnp.float32)        # init_hidden(bs) -> zeros
    hid0 = jax.random.normal(ks[7], (B, HIDDEN_SIZE), jnp.float32) * 0.1

    # ---- pure-JAX reference (one step of the original module) ----
    def ref_step(inp, cell, hidden):
        gates = (inp @ params["w_ih"] + params["b_ih"]
                 + hidden @ params["w_hh"] + params["b_hh"])
        H = HIDDEN_SIZE
        i, f, c, o = (gates[:, :H], gates[:, H:2 * H],
                      gates[:, 2 * H:3 * H], gates[:, 3 * H:4 * H])
        cell_n = jax.nn.sigmoid(f) * cell + jax.nn.sigmoid(i) * jnp.tanh(c)
        hid_n = jax.nn.sigmoid(o) * cell_n
        out = hid_n @ params["w_out"] + params["b_out"]
        heads = (out[:, :M], out[:, M:2 * M],
                 jnp.exp(out[:, 2 * M:3 * M]), jnp.exp(out[:, 3 * M:4 * M]),
                 jnp.tanh(out[:, 4 * M:5 * M]) * 0.9,
                 jax.nn.softmax(out[:, 5 * M:6 * M] + 1e-05, axis=-1) + 1e-05,
                 jax.nn.softmax(out[:, 6 * M:] + 1e-05, axis=-1) + 1e-05)
        return cell_n, hid_n, heads

    rc, rh = cell0, hid0
    ref_heads_per_step = []
    for t in range(T):
        rc, rh, ht = ref_step(inp_seq[t], rc, rh)
        ref_heads_per_step.append(ht)
    ref_heads = tuple(jnp.stack([h[k] for h in ref_heads_per_step]) for k in range(7))

    def check(kc, kh, k_heads):
        assert jnp.allclose(kc, rc, atol=1e-4, rtol=1e-4), "cell mismatch"
        assert jnp.allclose(kh, rh, atol=1e-4, rtol=1e-4), "hidden mismatch"
        for got, want in zip(k_heads, ref_heads):
            assert got.shape == want.shape
            assert jnp.allclose(got, want, atol=1e-4, rtol=1e-4), "head mismatch vs reference"

    # ---- fused-sequence kernel: single chunk (auto chunk size) ----
    (kc, kh), k_heads = sketchrnn_forward_seq(inp_seq, cell0, hid0, prepped, M)
    jax.block_until_ready((kc, kh) + k_heads)
    check(kc, kh, k_heads)

    # ---- multi-chunk grid, aligned (exercises cross-chunk state carry) ----
    (kc, kh), k_heads = sketchrnn_forward_seq(inp_seq, cell0, hid0, prepped, M, t_chunk=4)
    jax.block_until_ready((kc, kh) + k_heads)
    check(kc, kh, k_heads)

    # ---- multi-chunk grid, ragged last chunk (dynamic step count) ----
    (kc, kh), k_heads = sketchrnn_forward_seq(inp_seq, cell0, hid0, prepped, M, t_chunk=3)
    jax.block_until_ready((kc, kh) + k_heads)
    check(kc, kh, k_heads)

    # ---- single-step path (exact module-forward semantics) ----
    state, mx, my, vx, vy, cr, w, p = sketchrnn_forward(inp_seq[0], (cell0, hid0), prepped, M)
    c1, h1, heads1 = ref_step(inp_seq[0], cell0, hid0)
    jax.block_until_ready(state)
    assert jnp.allclose(state[0], c1, atol=1e-4, rtol=1e-4)
    assert jnp.allclose(state[1], h1, atol=1e-4, rtol=1e-4)
    for got, want in zip((mx, my, vx, vy, cr, w, p), heads1):
        assert got.shape == want.shape
        assert jnp.allclose(got, want, atol=1e-4, rtol=1e-4)

    print("KERNEL_OK")
</pallas_src>

<mosaic_0001>
module attributes {stable_mosaic.version = 11 : i64} {
  func.func @kernel(%arg0: i32, %arg1: memref<64x5xf32, #tpu.memory_space<vmem>>, %arg2: memref<8x32xf32, #tpu.memory_space<vmem>>, %arg3: memref<8x32xf32, #tpu.memory_space<vmem>>, %arg4: memref<5x128xf32, #tpu.memory_space<vmem>>, %arg5: memref<32x128xf32, #tpu.memory_space<vmem>>, %arg6: memref<1x128xf32, #tpu.memory_space<vmem>>, %arg7: memref<32x128xf32, #tpu.memory_space<vmem>>, %arg8: memref<1x128xf32, #tpu.memory_space<vmem>>, %arg9: memref<8x32xf32, #tpu.memory_space<vmem>>, %arg10: memref<8x32xf32, #tpu.memory_space<vmem>>, %arg11: memref<64x128xf32, #tpu.memory_space<vmem>>, %arg12: memref<64x128xf32, #tpu.memory_space<vmem>>, %arg13: memref<64x32xf32, #tpu.memory_space<vmem>>) attributes {dimension_semantics = [#tpu.dimension_semantics<arbitrary>], iteration_bounds = array<i64: 1>, scalar_prefetch = 0 : i64, scratch_operands = 2 : i64, tpu.core_type = #tpu.core_type<tc>, window_params = [{transform_indices = @transform_0, window_bounds = array<i64: 64, 5>}, {pipeline_mode = #tpu.pipeline_mode<synchronous>, transform_indices = @transform_1, window_bounds = array<i64: 8, 32>}, {pipeline_mode = #tpu.pipeline_mode<synchronous>, transform_indices = @transform_2, window_bounds = array<i64: 8, 32>}, {pipeline_mode = #tpu.pipeline_mode<synchronous>, transform_indices = @transform_3, window_bounds = array<i64: 5, 128>}, {pipeline_mode = #tpu.pipeline_mode<synchronous>, transform_indices = @transform_4, window_bounds = array<i64: 32, 128>}, {pipeline_mode = #tpu.pipeline_mode<synchronous>, transform_indices = @transform_5, window_bounds = array<i64: 1, 128>}, {pipeline_mode = #tpu.pipeline_mode<synchronous>, transform_indices = @transform_6, window_bounds = array<i64: 32, 128>}, {pipeline_mode = #tpu.pipeline_mode<synchronous>, transform_indices = @transform_7, window_bounds = array<i64: 1, 128>}, {pipeline_mode = #tpu.pipeline_mode<synchronous>, transform_indices = @transform_8, window_bounds = array<i64: 8, 32>}, {pipeline_mode = #tpu.pipeline_mode<synchronous>, transform_indices = @transform_9, window_bounds = array<i64: 8, 32>}, {transform_indices = @transform_10, window_bounds = array<i64: 64, 128>}]} {
    %c0_i32 = arith.constant 0 : i32
    %0 = arith.cmpi eq, %arg0, %c0_i32 : i32
    %1 = arith.extui %0 : i1 to i32
    %c0_i32_0 = arith.constant 0 : i32
    %2 = arith.cmpi ne, %1, %c0_i32_0 : i32
    scf.if %2 {
      %c0_84 = arith.constant 0 : index
      %c0_85 = arith.constant 0 : index
      %233 = vector.load %arg2[%c0_84, %c0_85] : memref<8x32xf32, #tpu.memory_space<vmem>>, vector<8x32xf32>
      %c0_86 = arith.constant 0 : index
      %c0_87 = arith.constant 0 : index
      %234 = vector.load %arg9[%c0_86, %c0_87] : memref<8x32xf32, #tpu.memory_space<vmem>>, vector<8x32xf32>
      tpu.vector_store %arg9[%c0_86, %c0_87], %233 {strides = array<i32>} : memref<8x32xf32, #tpu.memory_space<vmem>>, vector<8x32xf32>,
      %c0_88 = arith.constant 0 : index
      %c0_89 = arith.constant 0 : index
      %235 = vector.load %arg3[%c0_88, %c0_89] : memref<8x32xf32, #tpu.memory_space<vmem>>, vector<8x32xf32>
      %c0_90 = arith.constant 0 : index
      %c0_91 = arith.constant 0 : index
      %236 = vector.load %arg10[%c0_90, %c0_91] : memref<8x32xf32, #tpu.memory_space<vmem>>, vector<8x32xf32>
      tpu.vector_store %arg10[%c0_90, %c0_91], %235 {strides = array<i32>} : memref<8x32xf32, #tpu.memory_space<vmem>>, vector<8x32xf32>,
    } else {
    }
    %c0 = arith.constant 0 : index
    %c0_1 = arith.constant 0 : index
    %3 = vector.load %arg1[%c0, %c0_1] : memref<64x5xf32, #tpu.memory_space<vmem>>, vector<64x5xf32>
    %c0_2 = arith.constant 0 : index
    %c0_3 = arith.constant 0 : index
    %4 = vector.load %arg4[%c0_2, %c0_3] : memref<5x128xf32, #tpu.memory_space<vmem>>, vector<5x128xf32>
    %cst = arith.constant dense<0.000000e+00> : vector<64x128xf32>
    %5 = tpu.matmul %3, %4, %cst {dimension_numbers = #tpu.dot_dimension_numbers<[1], [0], [0], [1], [0, 0, 1, 1], [], []>} : vector<64x5xf32>, vector<5x128xf32>, vector<64x128xf32> -> vector<64x128xf32>
    %c0_4 = arith.constant 0 : index
    %c0_5 = arith.constant 0 : index
    %6 = vector.load %arg6[%c0_4, %c0_5] : memref<1x128xf32, #tpu.memory_space<vmem>>, vector<1x128xf32>
    %7 = vector.broadcast %6 : vector<1x128xf32> to vector<64x128xf32>
    %8 = arith.addf %5, %7 : vector<64x128xf32>
    %c0_6 = arith.constant 0 : index
    %c0_7 = arith.constant 0 : index
    %9 = vector.load %arg12[%c0_6, %c0_7] : memref<64x128xf32, #tpu.memory_space<vmem>>, vector<64x128xf32>
    tpu.vector_store %arg12[%c0_6, %c0_7], %8 {strides = array<i32>} : memref<64x128xf32, #tpu.memory_space<vmem>>, vector<64x128xf32>,
    %c0_8 = arith.constant 0 : index
    %c0_9 = arith.constant 0 : index
    %10 = vector.load %arg5[%c0_8, %c0_9] : memref<32x128xf32, #tpu.memory_space<vmem>>, vector<32x128xf32>
    %c0_10 = arith.constant 0 : index
    %c0_11 = arith.constant 0 : index
    %11 = vector.load %arg9[%c0_10, %c0_11] : memref<8x32xf32, #tpu.memory_space<vmem>>, vector<8x32xf32>
    %c0_12 = arith.constant 0 : index
    %c0_13 = arith.constant 0 : index
    %12 = vector.load %arg10[%c0_12, %c0_13] : memref<8x32xf32, #tpu.memory_space<vmem>>, vector<8x32xf32>
    %c0_14 = arith.constant 0 : index
    %c0_15 = arith.constant 0 : index
    %13 = vector.load %arg12[%c0_14, %c0_15] : memref<64x128xf32, #tpu.memory_space<vmem>>, vector<8x128xf32>
    %cst_16 = arith.constant dense<0.000000e+00> : vector<8x128xf32>
    %14 = tpu.matmul %12, %10, %cst_16 {dimension_numbers = #tpu.dot_dimension_numbers<[1], [0], [0], [1], [0, 0, 1, 1], [], []>} : vector<8x32xf32>, vector<32x128xf32>, vector<8x128xf32> -> vector<8x128xf32>
    %15 = arith.addf %13, %14 : vector<8x128xf32>
    %16 = arith.negf %15 : vector<8x128xf32>
    %17 = math.exp %16 : vector<8x128xf32>
    %cst_17 = arith.constant 1.000000e+00 : f32
    %18 = vector.broadcast %cst_17 : f32 to vector<8x128xf32>
    %19 = arith.addf %18, %17 : vector<8x128xf32>
    %20 = arith.divf %18, %19 : vector<8x128xf32>
    %21 = math.tanh %15 : vector<8x128xf32>
    %22 = vector.extract_strided_slice %20 {offsets = [0, 0], sizes = [8, 32], strides = [1, 1]} : vector<8x128xf32> to vector<8x32xf32>
    %23 = vector.extract_strided_slice %20 {offsets = [0, 32], sizes = [8, 32], strides = [1, 1]} : vector<8x128xf32> to vector<8x32xf32>
    %24 = vector.extract_strided_slice %21 {offsets = [0, 64], sizes = [8, 32], strides = [1, 1]} : vector<8x128xf32> to vector<8x32xf32>
    %25 = vector.extract_strided_slice %20 {offsets = [0, 96], sizes = [8, 32], strides = [1, 1]} : vector<8x128xf32> to vector<8x32xf32>
    %26 = arith.mulf %23, %11 : vector<8x32xf32>
    %27 = arith.mulf %22, %24 : vector<8x32xf32>
    %28 = arith.addf %26, %27 : vector<8x32xf32>
    %29 = arith.mulf %25, %28 : vector<8x32xf32>
    %c0_18 = arith.constant 0 : index
    %c0_19 = arith.constant 0 : index
    %30 = vector.load %arg13[%c0_18, %c0_19] : memref<64x32xf32, #tpu.memory_space<vmem>>, vector<8x32xf32>
    tpu.vector_store %arg13[%c0_18, %c0_19], %29 {strides = array<i32>} : memref<64x32xf32, #tpu.memory_space<vmem>>, vector<8x32xf32>,
    %c8 = arith.constant 8 : index
    %c0_20 = arith.constant 0 : index
    %31 = vector.load %arg12[%c8, %c0_20] : memref<64x128xf32, #tpu.memory_space<vmem>>, vector<8x128xf32>
    %cst_21 = arith.constant dense<0.000000e+00> : vector<8x128xf32>
    %32 = tpu.matmul %29, %10, %cst_21 {dimension_numbers = #tpu.dot_dimension_numbers<[1], [0], [0], [1], [0, 0, 1, 1], [], []>} : vector<8x32xf32>, vector<32x128xf32>, vector<8x128xf32> -> vector<8x128xf32>
    %33 = arith.addf %31, %32 : vector<8x128xf32>
    %34 = arith.negf %33 : vector<8x128xf32>
    %35 = math.exp %34 : vector<8x128xf32>
    %cst_22 = arith.constant 1.000000e+00 : f32
    %36 = vector.broadcast %cst_22 : f32 to vector<8x128xf32>
    %37 = arith.addf %36, %35 : vector<8x128xf32>
    %38 = arith.divf %36, %37 : vector<8x128xf32>
    %39 = math.tanh %33 : vector<8x128xf32>
    %40 = vector.extract_strided_slice %38 {offsets = [0, 0], sizes = [8, 32], strides = [1, 1]} : vector<8x128xf32> to vector<8x32xf32>
    %41 = vector.extract_strided_slice %38 {offsets = [0, 32], sizes = [8, 32], strides = [1, 1]} : vector<8x128xf32> to vector<8x32xf32>
    %42 = vector.extract_strided_slice %39 {offsets = [0, 64], sizes = [8, 32], strides = [1, 1]} : vector<8x128xf32> to vector<8x32xf32>
    %43 = vector.extract_strided_slice %38 {offsets = [0, 96], sizes = [8, 32], strides = [1, 1]} : vector<8x128xf32> to vector<8x32xf32>
    %44 = arith.mulf %41, %28 : vector<8x32xf32>
    %45 = arith.mulf %40, %42 : vector<8x32xf32>
    %46 = arith.addf %44, %45 : vector<8x32xf32>
    %47 = arith.mulf %43, %46 : vector<8x32xf32>
    %c8_23 = arith.constant 8 : index
    %c0_24 = arith.constant 0 : index
    %48 = vector.load %arg13[%c8_23, %c0_24] : memref<64x32xf32, #tpu.memory_space<vmem>>, vector<8x32xf32>
    tpu.vector_store %arg13[%c8_23, %c0_24], %47 {strides = array<i32>} : memref<64x32xf32, #tpu.memory_space<vmem>>, vector<8x32xf32>,
    %c16 = arith.constant 16 : index
    %c0_25 = arith.constant 0 : index
    %49 = vector.load %arg12[%c16, %c0_25] : memref<64x128xf32, #tpu.memory_space<vmem>>, vector<8x128xf32>
    %cst_26 = arith.constant dense<0.000000e+00> : vector<8x128xf32>
    %50 = tpu.matmul %47, %10, %cst_26 {dimension_numbers = #tpu.dot_dimension_numbers<[1], [0], [0], [1], [0, 0, 1, 1], [], []>} : vector<8x32xf32>, vector<32x128xf32>, vector<8x128xf32> -> vector<8x128xf32>
    %51 = arith.addf %49, %50 : vector<8x128xf32>
    %52 = arith.negf %51 : vector<8x128xf32>
    %53 = math.exp %52 : vector<8x128xf32>
    %cst_27 = arith.constant 1.000000e+00 : f32
    %54 = vector.broadcast %cst_27 : f32 to vector<8x128xf32>
    %55 = arith.addf %54, %53 : vector<8x128xf32>
    %56 = arith.divf %54, %55 : vector<8x128xf32>
    %57 = math.tanh %51 : vector<8x128xf32>
    %58 = vector.extract_strided_slice %56 {offsets = [0, 0], sizes = [8, 32], strides = [1, 1]} : vector<8x128xf32> to vector<8x32xf32>
    %59 = vector.extract_strided_slice %56 {offsets = [0, 32], sizes = [8, 32], strides = [1, 1]} : vector<8x128xf32> to vector<8x32xf32>
    %60 = vector.extract_strided_slice %57 {offsets = [0, 64], sizes = [8, 32], strides = [1, 1]} : vector<8x128xf32> to vector<8x32xf32>
    %61 = vector.extract_strided_slice %56 {offsets = [0, 96], sizes = [8, 32], strides = [1, 1]} : vector<8x128xf32> to vector<8x32xf32>
    %62 = arith.mulf %59, %46 : vector<8x32xf32>
    %63 = arith.mulf %58, %60 : vector<8x32xf32>
    %64 = arith.addf %62, %63 : vector<8x32xf32>
    %65 = arith.mulf %61, %64 : vector<8x32xf32>
    %c16_28 = arith.constant 16 : index
    %c0_29 = arith.constant 0 : index
    %66 = vector.load %arg13[%c16_28, %c0_29] : memref<64x32xf32, #tpu.memory_space<vmem>>, vector<8x32xf32>
    tpu.vector_store %arg13[%c16_28, %c0_29], %65 {strides = array<i32>} : memref<64x32xf32, #tpu.memory_space<vmem>>, vector<8x32xf32>,
    %c24 = arith.constant 24 : index
    %c0_30 = arith.constant 0 : index
    %67 = vector.load %arg12[%c24, %c0_30] : memref<64x128xf32, #tpu.memory_space<vmem>>, vector<8x128xf32>
    %cst_31 = arith.constant dense<0.000000e+00> : vector<8x128xf32>
    %68 = tpu.matmul %65, %10, %cst_31 {dimension_numbers = #tpu.dot_dimension_numbers<[1], [0], [0], [1], [0, 0, 1, 1], [], []>} : vector<8x32xf32>, vector<32x128xf32>, vector<8x128xf32> -> vector<8x128xf32>
    %69 = arith.addf %67, %68 : vector<8x128xf32>
    %70 = arith.negf %69 : vector<8x128xf32>
    %71 = math.exp %70 : vector<8x128xf32>
    %cst_32 = arith.constant 1.000000e+00 : f32
    %72 = vector.broadcast %cst_32 : f32 to vector<8x128xf32>
    %73 = arith.addf %72, %71 : vector<8x128xf32>
    %74 = arith.divf %72, %73 : vector<8x128xf32>
    %75 = math.tanh %69 : vector<8x128xf32>
    %76 = vector.extract_strided_slice %74 {offsets = [0, 0], sizes = [8, 32], strides = [1, 1]} : vector<8x128xf32> to vector<8x32xf32>
    %77 = vector.extract_strided_slice %74 {offsets = [0, 32], sizes = [8, 32], strides = [1, 1]} : vector<8x128xf32> to vector<8x32xf32>
    %78 = vector.extract_strided_slice %75 {offsets = [0, 64], sizes = [8, 32], strides = [1, 1]} : vector<8x128xf32> to vector<8x32xf32>
    %79 = vector.extract_strided_slice %74 {offsets = [0, 96], sizes = [8, 32], strides = [1, 1]} : vector<8x128xf32> to vector<8x32xf32>
    %80 = arith.mulf %77, %64 : vector<8x32xf32>
    %81 = arith.mulf %76, %78 : vector<8x32xf32>
    %82 = arith.addf %80, %81 : vector<8x32xf32>
    %83 = arith.mulf %79, %82 : vector<8x32xf32>
    %c24_33 = arith.constant 24 : index
    %c0_34 = arith.constant 0 : index
    %84 = vector.load %arg13[%c24_33, %c0_34] : memref<64x32xf32, #tpu.memory_space<vmem>>, vector<8x32xf32>
    tpu.vector_store %arg13[%c24_33, %c0_34], %83 {strides = array<i32>} : memref<64x32xf32, #tpu.memory_space<vmem>>, vector<8x32xf32>,
    %c32 = arith.constant 32 : index
    %c0_35 = arith.constant 0 : index
    %85 = vector.load %arg12[%c32, %c0_35] : memref<64x128xf32, #tpu.memory_space<vmem>>, vector<8x128xf32>
    %cst_36 = arith.constant dense<0.000000e+00> : vector<8x128xf32>
    %86 = tpu.matmul %83, %10, %cst_36 {dimension_numbers = #tpu.dot_dimension_numbers<[1], [0], [0], [1], [0, 0, 1, 1], [], []>} : vector<8x32xf32>, vector<32x128xf32>, vector<8x128xf32> -> vector<8x128xf32>
    %87 = arith.addf %85, %86 : vector<8x128xf32>
    %88 = arith.negf %87 : vector<8x128xf32>
    %89 = math.exp %88 : vector<8x128xf32>
    %cst_37 = arith.constant 1.000000e+00 : f32
    %90 = vector.broadcast %cst_37 : f32 to vector<8x128xf32>
    %91 = arith.addf %90, %89 : vector<8x128xf32>
    %92 = arith.divf %90, %91 : vector<8x128xf32>
    %93 = math.tanh %87 : vector<8x128xf32>
    %94 = vector.extract_strided_slice %92 {offsets = [0, 0], sizes = [8, 32], strides = [1, 1]} : vector<8x128xf32> to vector<8x32xf32>
    %95 = vector.extract_strided_slice %92 {offsets = [0, 32], sizes = [8, 32], strides = [1, 1]} : vector<8x128xf32> to vector<8x32xf32>
    %96 = vector.extract_strided_slice %93 {offsets = [0, 64], sizes = [8, 32], strides = [1, 1]} : vector<8x128xf32> to vector<8x32xf32>
    %97 = vector.extract_strided_slice %92 {offsets = [0, 96], sizes = [8, 32], strides = [1, 1]} : vector<8x128xf32> to vector<8x32xf32>
    %98 = arith.mulf %95, %82 : vector<8x32xf32>
    %99 = arith.mulf %94, %96 : vector<8x32xf32>
    %100 = arith.addf %98, %99 : vector<8x32xf32>
    %101 = arith.mulf %97, %100 : vector<8x32xf32>
    %c32_38 = arith.constant 32 : index
    %c0_39 = arith.constant 0 : index
    %102 = vector.load %arg13[%c32_38, %c0_39] : memref<64x32xf32, #tpu.memory_space<vmem>>, vector<8x32xf32>
    tpu.vector_store %arg13[%c32_38, %c0_39], %101 {strides = array<i32>} : memref<64x32xf32, #tpu.memory_space<vmem>>, vector<8x32xf32>,
    %c40 = arith.constant 40 : index
    %c0_40 = arith.constant 0 : index
    %103 = vector.load %arg12[%c40, %c0_40] : memref<64x128xf32, #tpu.memory_space<vmem>>, vector<8x128xf32>
    %cst_41 = arith.constant dense<0.000000e+00> : vector<8x128xf32>
    %104 = tpu.matmul %101, %10, %cst_41 {dimension_numbers = #tpu.dot_dimension_numbers<[1], [0], [0], [1], [0, 0, 1, 1], [], []>} : vector<8x32xf32>, vector<32x128xf32>, vector<8x128xf32> -> vector<8x128xf32>
    %105 = arith.addf %103, %104 : vector<8x128xf32>
    %106 = arith.negf %105 : vector<8x128xf32>
    %107 = math.exp %106 : vector<8x128xf32>
    %cst_42 = arith.constant 1.000000e+00 : f32
    %108 = vector.broadcast %cst_42 : f32 to vector<8x128xf32>
    %109 = arith.addf %108, %107 : vector<8x128xf32>
    %110 = arith.divf %108, %109 : vector<8x128xf32>
    %111 = math.tanh %105 : vector<8x128xf32>
    %112 = vector.extract_strided_slice %110 {offsets = [0, 0], sizes = [8, 32], strides = [1, 1]} : vector<8x128xf32> to vector<8x32xf32>
    %113 = vector.extract_strided_slice %110 {offsets = [0, 32], sizes = [8, 32], strides = [1, 1]} : vector<8x128xf32> to vector<8x32xf32>
    %114 = vector.extract_strided_slice %111 {offsets = [0, 64], sizes = [8, 32], strides = [1, 1]} : vector<8x128xf32> to vector<8x32xf32>
    %115 = vector.extract_strided_slice %110 {offsets = [0, 96], sizes = [8, 32], strides = [1, 1]} : vector<8x128xf32> to vector<8x32xf32>
    %116 = arith.mulf %113, %100 : vector<8x32xf32>
    %117 = arith.mulf %112, %114 : vector<8x32xf32>
    %118 = arith.addf %116, %117 : vector<8x32xf32>
    %119 = arith.mulf %115, %118 : vector<8x32xf32>
    %c40_43 = arith.constant 40 : index
    %c0_44 = arith.constant 0 : index
    %120 = vector.load %arg13[%c40_43, %c0_44] : memref<64x32xf32, #tpu.memory_space<vmem>>, vector<8x32xf32>
    tpu.vector_store %arg13[%c40_43, %c0_44], %119 {strides = array<i32>} : memref<64x32xf32, #tpu.memory_space<vmem>>, vector<8x32xf32>,
    %c48 = arith.constant 48 : index
    %c0_45 = arith.constant 0 : index
    %121 = vector.load %arg12[%c48, %c0_45] : memref<64x128xf32, #tpu.memory_space<vmem>>, vector<8x128xf32>
    %cst_46 = arith.constant dense<0.000000e+00> : vector<8x128xf32>
    %122 = tpu.matmul %119, %10, %cst_46 {dimension_numbers = #tpu.dot_dimension_numbers<[1], [0], [0], [1], [0, 0, 1, 1], [], []>} : vector<8x32xf32>, vector<32x128xf32>, vector<8x128xf32> -> vector<8x128xf32>
    %123 = arith.addf %121, %122 : vector<8x128xf32>
    %124 = arith.negf %123 : vector<8x128xf32>
    %125 = math.exp %124 : vector<8x128xf32>
    %cst_47 = arith.constant 1.000000e+00 : f32
    %126 = vector.broadcast %cst_47 : f32 to vector<8x128xf32>
    %127 = arith.addf %126, %125 : vector<8x128xf32>
    %128 = arith.divf %126, %127 : vector<8x128xf32>
    %129 = math.tanh %123 : vector<8x128xf32>
    %130 = vector.extract_strided_slice %128 {offsets = [0, 0], sizes = [8, 32], strides = [1, 1]} : vector<8x128xf32> to vector<8x32xf32>
    %131 = vector.extract_strided_slice %128 {offsets = [0, 32], sizes = [8, 32], strides = [1, 1]} : vector<8x128xf32> to vector<8x32xf32>
    %132 = vector.extract_strided_slice %129 {offsets = [0, 64], sizes = [8, 32], strides = [1, 1]} : vector<8x128xf32> to vector<8x32xf32>
    %133 = vector.extract_strided_slice %128 {offsets = [0, 96], sizes = [8, 32], strides = [1, 1]} : vector<8x128xf32> to vector<8x32xf32>
    %134 = arith.mulf %131, %118 : vector<8x32xf32>
    %135 = arith.mulf %130, %132 : vector<8x32xf32>
    %136 = arith.addf %134, %135 : vector<8x32xf32>
    %137 = arith.mulf %133, %136 : vector<8x32xf32>
    %c48_48 = arith.constant 48 : index
    %c0_49 = arith.constant 0 : index
    %138 = vector.load %arg13[%c48_48, %c0_49] : memref<64x32xf32, #tpu.memory_space<vmem>>, vector<8x32xf32>
    tpu.vector_store %arg13[%c48_48, %c0_49], %137 {strides = array<i32>} : memref<64x32xf32, #tpu.memory_space<vmem>>, vector<8x32xf32>,
    %c56 = arith.constant 56 : index
    %c0_50 = arith.constant 0 : index
    %139 = vector.load %arg12[%c56, %c0_50] : memref<64x128xf32, #tpu.memory_space<vmem>>, vector<8x128xf32>
    %cst_51 = arith.constant dense<0.000000e+00> : vector<8x128xf32>
    %140 = tpu.matmul %137, %10, %cst_51 {dimension_numbers = #tpu.dot_dimension_numbers<[1], [0], [0], [1], [0, 0, 1, 1], [], []>} : vector<8x32xf32>, vector<32x128xf32>, vector<8x128xf32> -> vector<8x128xf32>
    %141 = arith.addf %139, %140 : vector<8x128xf32>
    %142 = arith.negf %141 : vector<8x128xf32>
    %143 = math.exp %142 : vector<8x128xf32>
    %cst_52 = arith.constant 1.000000e+00 : f32
    %144 = vector.broadcast %cst_52 : f32 to vector<8x128xf32>
    %145 = arith.addf %144, %143 : vector<8x128xf32>
    %146 = arith.divf %144, %145 : vector<8x128xf32>
    %147 = math.tanh %141 : vector<8x128xf32>
    %148 = vector.extract_strided_slice %146 {offsets = [0, 0], sizes = [8, 32], strides = [1, 1]} : vector<8x128xf32> to vector<8x32xf32>
    %149 = vector.extract_strided_slice %146 {offsets = [0, 32], sizes = [8, 32], strides = [1, 1]} : vector<8x128xf32> to vector<8x32xf32>
    %150 = vector.extract_strided_slice %147 {offsets = [0, 64], sizes = [8, 32], strides = [1, 1]} : vector<8x128xf32> to vector<8x32xf32>
    %151 = vector.extract_strided_slice %146 {offsets = [0, 96], sizes = [8, 32], strides = [1, 1]} : vector<8x128xf32> to vector<8x32xf32>
    %152 = arith.mulf %149, %136 : vector<8x32xf32>
    %153 = arith.mulf %148, %150 : vector<8x32xf32>
    %154 = arith.addf %152, %153 : vector<8x32xf32>
    %155 = arith.mulf %151, %154 : vector<8x32xf32>
    %c56_53 = arith.constant 56 : index
    %c0_54 = arith.constant 0 : index
    %156 = vector.load %arg13[%c56_53, %c0_54] : memref<64x32xf32, #tpu.memory_space<vmem>>, vector<8x32xf32>
    tpu.vector_store %arg13[%c56_53, %c0_54], %155 {strides = array<i32>} : memref<64x32xf32, #tpu.memory_space<vmem>>, vector<8x32xf32>,
    %c0_55 = arith.constant 0 : index
    %c0_56 = arith.constant 0 : index
    %157 = vector.load %arg9[%c0_55, %c0_56] : memref<8x32xf32, #tpu.memory_space<vmem>>, vector<8x32xf32>
    tpu.vector_store %arg9[%c0_55, %c0_56], %154 {strides = array<i32>} : memref<8x32xf32, #tpu.memory_space<vmem>>, vector<8x32xf32>,
    %c0_57 = arith.constant 0 : index
    %c0_58 = arith.constant 0 : index
    %158 = vector.load %arg10[%c0_57, %c0_58] : memref<8x32xf32, #tpu.memory_space<vmem>>, vector<8x32xf32>
    tpu.vector_store %arg10[%c0_57, %c0_58], %155 {strides = array<i32>} : memref<8x32xf32, #tpu.memory_space<vmem>>, vector<8x32xf32>,
    %c0_59 = arith.constant 0 : index
    %c0_60 = arith.constant 0 : index
    %159 = vector.load %arg13[%c0_59, %c0_60] : memref<64x32xf32, #tpu.memory_space<vmem>>, vector<64x32xf32>
    %c0_61 = arith.constant 0 : index
    %c0_62 = arith.constant 0 : index
    %160 = vector.load %arg7[%c0_61, %c0_62] : memref<32x128xf32, #tpu.memory_space<vmem>>, vector<32x128xf32>
    %cst_63 = arith.constant dense<0.000000e+00> : vector<64x128xf32>
    %161 = tpu.matmul %159, %160, %cst_63 {dimension_numbers = #tpu.dot_dimension_numbers<[1], [0], [0], [1], [0, 0, 1, 1], [], []>} : vector<64x32xf32>, vector<32x128xf32>, vector<64x128xf32> -> vector<64x128xf32>
    %c0_64 = arith.constant 0 : index
    %c0_65 = arith.constant 0 : index
    %162 = vector.load %arg8[%c0_64, %c0_65] : memref<1x128xf32, #tpu.memory_space<vmem>>, vector<1x128xf32>
    %163 = vector.broadcast %162 : vector<1x128xf32> to vector<64x128xf32>
    %164 = arith.addf %161, %163 : vector<64x128xf32>
    %165 = tpu.iota {dimensions = array<i32: 1>} : vector<64x128xi32>
    %c16_i32 = arith.constant 16 : i32
    %166 = vector.broadcast %c16_i32 : i32 to vector<64x128xi32>
    %167 = arith.cmpi sge, %165, %166 : vector<64x128xi32>
    %c32_i32 = arith.constant 32 : i32
    %168 = vector.broadcast %c32_i32 : i32 to vector<64x128xi32>
    %169 = arith.cmpi slt, %165, %168 : vector<64x128xi32>
    %170 = arith.andi %167, %169 : vector<64x128xi1>
    %c32_i32_66 = arith.constant 32 : i32
    %171 = vector.broadcast %c32_i32_66 : i32 to vector<64x128xi32>
    %172 = arith.cmpi sge, %165, %171 : vector<64x128xi32>
    %c40_i32 = arith.constant 40 : i32
    %173 = vector.broadcast %c40_i32 : i32 to vector<64x128xi32>
    %174 = arith.cmpi slt, %165, %173 : vector<64x128xi32>
    %175 = arith.andi %172, %174 : vector<64x128xi1>
    %c40_i32_67 = arith.constant 40 : i32
    %176 = vector.broadcast %c40_i32_67 : i32 to vector<64x128xi32>
    %177 = arith.cmpi sge, %165, %176 : vector<64x128xi32>
    %c48_i32 = arith.constant 48 : i32
    %178 = vector.broadcast %c48_i32 : i32 to vector<64x128xi32>
    %179 = arith.cmpi slt, %165, %178 : vector<64x128xi32>
    %180 = arith.andi %177, %179 : vector<64x128xi1>
    %c48_i32_68 = arith.constant 48 : i32
    %181 = vector.broadcast %c48_i32_68 : i32 to vector<64x128xi32>
    %182 = arith.cmpi sge, %165, %181 : vector<64x128xi32>
    %c51_i32 = arith.constant 51 : i32
    %183 = vector.broadcast %c51_i32 : i32 to vector<64x128xi32>
    %184 = arith.cmpi slt, %165, %183 : vector<64x128xi32>
    %185 = arith.andi %182, %184 : vector<64x128xi1>
    %186 = arith.ori %180, %185 : vector<64x128xi1>
    %c51_i32_69 = arith.constant 51 : i32
    %187 = vector.broadcast %c51_i32_69 : i32 to vector<64x128xi32>
    %188 = arith.cmpi sge, %165, %187 : vector<64x128xi32>
    %cst_70 = arith.constant -1.000000e+30 : f32
    %189 = vector.broadcast %cst_70 : f32 to vector<64x128xf32>
    %190 = arith.select %180, %164, %189 : vector<64x128xi1>, vector<64x128xf32>
    %cst_71 = arith.constant dense<0xFF800000> : vector<64xf32>
    %191 = vector.multi_reduction <maximumf>, %190, %cst_71 [1] : vector<64x128xf32> to vector<64xf32>
    %192 = vector.shape_cast %191 : vector<64xf32> to vector<64x1xf32>
    %cst_72 = arith.constant -1.000000e+30 : f32
    %193 = vector.broadcast %cst_72 : f32 to vector<64x128xf32>
    %194 = arith.select %185, %164, %193 : vector<64x128xi1>, vector<64x128xf32>
    %cst_73 = arith.constant dense<0xFF800000> : vector<64xf32>
    %195 = vector.multi_reduction <maximumf>, %194, %cst_73 [1] : vector<64x128xf32> to vector<64xf32>
    %196 = vector.shape_cast %195 : vector<64xf32> to vector<64x1xf32>
    %cst_74 = arith.constant 0.000000e+00 : f32
    %197 = vector.shape_cast %196 : vector<64x1xf32> to vector<64x1xf32>
    %198 = vector.broadcast %197 : vector<64x1xf32> to vector<64x128xf32>
    %199 = vector.broadcast %cst_74 : f32 to vector<64x128xf32>
    %200 = arith.select %185, %198, %199 : vector<64x128xi1>, vector<64x128xf32>
    %201 = vector.shape_cast %192 : vector<64x1xf32> to vector<64x1xf32>
    %202 = vector.broadcast %201 : vector<64x1xf32> to vector<64x128xf32>
    %203 = arith.select %180, %202, %200 : vector<64x128xi1>, vector<64x128xf32>
    %204 = arith.subf %164, %203 : vector<64x128xf32>
    %205 = math.exp %204 : vector<64x128xf32>
    %cst_75 = arith.constant 0.000000e+00 : f32
    %206 = vector.broadcast %cst_75 : f32 to vector<64x128xf32>
    %207 = arith.select %180, %205, %206 : vector<64x128xi1>, vector<64x128xf32>
    %cst_76 = arith.constant dense<0.000000e+00> : vector<64xf32>
    %208 = vector.multi_reduction <add>, %207, %cst_76 [1] : vector<64x128xf32> to vector<64xf32>
    %209 = vector.shape_cast %208 : vector<64xf32> to vector<64x1xf32>
    %cst_77 = arith.constant 0.000000e+00 : f32
    %210 = vector.broadcast %cst_77 : f32 to vector<64x128xf32>
    %211 = arith.select %185, %205, %210 : vector<64x128xi1>, vector<64x128xf32>
    %cst_78 = arith.constant dense<0.000000e+00> : vector<64xf32>
    %212 = vector.multi_reduction <add>, %211, %cst_78 [1] : vector<64x128xf32> to vector<64xf32>
    %213 = vector.shape_cast %212 : vector<64xf32> to vector<64x1xf32>
    %214 = tpu.reciprocal %209 : vector<64x1xf32> -> vector<64x1xf32>
    %215 = tpu.reciprocal %213 : vector<64x1xf32> -> vector<64x1xf32>
    %216 = vector.shape_cast %214 : vector<64x1xf32> to vector<64x1xf32>
    %217 = vector.broadcast %216 : vector<64x1xf32> to vector<64x128xf32>
    %218 = vector.shape_cast %215 : vector<64x1xf32> to vector<64x1xf32>
    %219 = vector.broadcast %218 : vector<64x1xf32> to vector<64x128xf32>
    %220 = arith.select %180, %217, %219 : vector<64x128xi1>, vector<64x128xf32>
    %221 = arith.select %170, %205, %164 : vector<64x128xi1>, vector<64x128xf32>
    %222 = math.tanh %164 : vector<64x128xf32>
    %cst_79 = arith.constant 0.899999976 : f32
    %223 = vector.broadcast %cst_79 : f32 to vector<64x128xf32>
    %224 = arith.mulf %223, %222 : vector<64x128xf32>
    %225 = arith.select %175, %224, %221 : vector<64x128xi1>, vector<64x128xf32>
    %226 = arith.mulf %205, %220 : vector<64x128xf32>
    %cst_80 = arith.constant 9.99999974E-6 : f32
    %227 = vector.broadcast %cst_80 : f32 to vector<64x128xf32>
    %228 = arith.addf %226, %227 : vector<64x128xf32>
    %229 = arith.select %186, %228, %225 : vector<64x128xi1>, vector<64x128xf32>
    %cst_81 = arith.constant 0.000000e+00 : f32
    %230 = vector.broadcast %cst_81 : f32 to vector<64x128xf32>
    %231 = arith.select %188, %230, %229 : vector<64x128xi1>, vector<64x128xf32>
    %c0_82 = arith.constant 0 : index
    %c0_83 = arith.constant 0 : index
    %232 = vector.load %arg11[%c0_82, %c0_83] : memref<64x128xf32, #tpu.memory_space<vmem>>, vector<64x128xf32>
    tpu.vector_store %arg11[%c0_82, %c0_83], %231 {strides = array<i32>} : memref<64x128xf32, #tpu.memory_space<vmem>>, vector<64x128xf32>,
    return
  }
  func.func @transform_0(%arg0: i32) -> (i32, i32) {
    %c0_i32 = arith.constant 0 : i32
    %c0_i32_0 = arith.constant 0 : i32
    return %arg0, %c0_i32 : i32, i32
  }
  func.func @transform_1(%arg0: i32) -> (i32, i32) {
    %c0_i32 = arith.constant 0 : i32
    %c0_i32_0 = arith.constant 0 : i32
    %c0_i32_1 = arith.constant 0 : i32
    return %c0_i32, %c0_i32_0 : i32, i32
  }
  func.func @transform_2(%arg0: i32) -> (i32, i32) {
    %c0_i32 = arith.constant 0 : i32
    %c0_i32_0 = arith.constant 0 : i32
    %c0_i32_1 = arith.constant 0 : i32
    return %c0_i32, %c0_i32_0 : i32, i32
  }
  func.func @transform_3(%arg0: i32) -> (i32, i32) {
    %c0_i32 = arith.constant 0 : i32
    %c0_i32_0 = arith.constant 0 : i32
    %c0_i32_1 = arith.constant 0 : i32
    return %c0_i32, %c0_i32_0 : i32, i32
  }
  func.func @transform_4(%arg0: i32) -> (i32, i32) {
    %c0_i32 = arith.constant 0 : i32
    %c0_i32_0 = arith.constant 0 : i32
    %c0_i32_1 = arith.constant 0 : i32
    return %c0_i32, %c0_i32_0 : i32, i32
  }
  func.func @transform_5(%arg0: i32) -> (i32, i32) {
    %c0_i32 = arith.constant 0 : i32
    %c0_i32_0 = arith.constant 0 : i32
    %c0_i32_1 = arith.constant 0 : i32
    return %c0_i32, %c0_i32_0 : i32, i32
  }
  func.func @transform_6(%arg0: i32) -> (i32, i32) {
    %c0_i32 = arith.constant 0 : i32
    %c0_i32_0 = arith.constant 0 : i32
    %c0_i32_1 = arith.constant 0 : i32
    return %c0_i32, %c0_i32_0 : i32, i32
  }
  func.func @transform_7(%arg0: i32) -> (i32, i32) {
    %c0_i32 = arith.constant 0 : i32
    %c0_i32_0 = arith.constant 0 : i32
    %c0_i32_1 = arith.constant 0 : i32
    return %c0_i32, %c0_i32_0 : i32, i32
  }
  func.func @transform_8(%arg0: i32) -> (i32, i32) {
    %c0_i32 = arith.constant 0 : i32
    %c0_i32_0 = arith.constant 0 : i32
    %c0_i32_1 = arith.constant 0 : i32
    return %c0_i32, %c0_i32_0 : i32, i32
  }
  func.func @transform_9(%arg0: i32) -> (i32, i32) {
    %c0_i32 = arith.constant 0 : i32
    %c0_i32_0 = arith.constant 0 : i32
    %c0_i32_1 = arith.constant 0 : i32
    return %c0_i32, %c0_i32_0 : i32, i32
  }
  func.func @transform_10(%arg0: i32) -> (i32, i32) {
    %c0_i32 = arith.constant 0 : i32
    %c0_i32_0 = arith.constant 0 : i32
    return %arg0, %c0_i32 : i32, i32
  }
}

</mosaic_0001>

<bundles_post_ra>
// kernel: tpu_custom_call.1
= control target key start
LH: loop header
LB: loop body
LE: loop exit
PB: predicated region body
PF: predicated region fallthrough
CT: control target
= control target key end

     0   :  { %16 = vsyncpa [#allocation5], 0  ;;  %s2389_s0 = inlined_call_operand.vmem [shape: f32[64,5], index: 0, kind: input, shape index: {}]   ;;  %s2390_s1 = inlined_call_operand.vmem [shape: f32[8,32], index: 1, kind: input, shape index: {}]   ;;  %s2391_s2 = inlined_call_operand.hbm [shape: f32[8,32], index: 2, kind: input, shape index: {}]   ;;  %s2392_s3 = inlined_call_operand.hbm [shape: f32[5,128], index: 3, kind: input, shape index: {}]   ;;  %s2393_s4 = inlined_call_operand.vmem [shape: f32[32,128], index: 4, kind: input, shape index: {}]   ;;  %s2394_s5 = inlined_call_operand.vmem [shape: f32[1,128], index: 5, kind: input, shape index: {}]   ;;  %s2395_s6 = inlined_call_operand.vmem [shape: f32[32,128], index: 6, kind: input, shape index: {}]   ;;  %s2396_s7 = inlined_call_operand.vmem [shape: f32[1,128], index: 7, kind: input, shape index: {}]   ;;  %s2397_s8 = inlined_call_operand.hbm [shape: f32[8,32], index: 8, kind: output, shape index: {0}]   ;;  %s2398_s9 = inlined_call_operand.hbm [shape: f32[8,32], index: 9, kind: output, shape index: {1}]   ;;  %s2399_s10 = inlined_call_operand.hbm [shape: f32[64,128], index: 10, kind: output, shape index: {2}]  }
   0x1   :  { %17 = vsyncpa [#allocation8], 0 }
   0x2   :  { %18 = vsyncpa [#allocation6], 0 }
   0x3   :  { %19 = vsyncpa [#allocation11], 0  ;;  %s29_s15 = sshll.u32 %s2391_s2, 4  ;;  %s1577_s16 = smov [#allocation4]   ;;  %s30_s15 = int_to_ptr.hbm [resolvable:$true] %s29_s15 }
   0x4   :  { %s31_s17 = sshll.u32 %s1577_s16, 4  ;;  %s40_s20 = sshll.u32 %s2392_s3, 4  ;;  %s32_s17 = int_to_ptr.vmem [resolvable:$true] %s31_s17  ;;  %s41_s20 = int_to_ptr.hbm [resolvable:$true] %s40_s20 }
   0x5   :  { %34 = dma.hbm_to_vmem [thread:$0]  %s30_s15, 128, %s32_s17, [#allocation5]  }
   0x6   :  { %s1578_s21 = smov [#allocation7]  }
   0x7   :  { %s42_s22 = sshll.u32 %s1578_s21, 4  ;;  %s43_s22 = int_to_ptr.vmem [resolvable:$true] %s42_s22 }
   0x8   :  { %45 = dma.hbm_to_vmem [thread:$0]  %s41_s20, 128, %s43_s22, [#allocation8]  }
   0x9   :  { %1569 = dma.done.wait [#allocation5], 128  }
   0xa   :  { %1570 = vsyncadd [#allocation5], 4294967168 }
   0xb   :  { %1571 = dma.done.wait [#allocation8], 128  }
   0xc   :  { %1572 = vsyncadd [#allocation8], 4294967168  ;;  %vm109_vm0 = vcmask 1044480   ;;  %vm84_vm1 = vcmask 39936   ;;  %v79_v0 = vld [vmem:[#allocation7] sm:$0x1f] }
   0xd   :  { %v78_v1 = vld [vmem:[%s2389_s0 + $0x38] sm:$0xff]  ;;  %vm2400_vm2 = vcmask 261120   ;;  %1320 = vmatpush.msk.msra.mxu2 %vm109_vm0, %v79_v0  ;;  %v1659_v3 = vld [vmem:[%s2393_s4 + $0x10] sm:$0xff]  ;;  %1287 = vmatpush.msk.msra.mxu0 %vm109_vm0, %v79_v0  ;;  %v69_v4 = vld [vmem:[#allocation4] sm:$0xff]  ;;  %s1579_s16 = smov 64   ;;  %s1254_s15 = sshll.u32 %s2398_s9, 4  ;;  %s1255_s15 = int_to_ptr.hbm [resolvable:$true] %s1254_s15 }
   0xe   :  { %v1654_v2 = vld [vmem:[%s2393_s4 + $0x18] sm:$0xff]  ;;  %1295 = vmatmul.msk.f32.vlgmr.msra.gmra.mxu2 %vm84_vm1, %v78_v1  ;;  %v71_v5 = vld [vmem:[%s2389_s0] sm:$0xff]  ;;  %70 = vst.msk [vmem:[#allocation10] sm:$0xff] %vm2400_vm2, %v69_v4  ;;  %v1672_v6 = vld [vmem:[%s2393_s4 + $0x8] sm:$0xff]  ;;  %s1583_s9 = smov [#allocation9]   ;;  %s1243_s19 = sshll.u32 %s2397_s8, 4  ;;  %s1244_s19 = int_to_ptr.hbm [resolvable:$true] %s1243_s19 }
   0xf   :  { %319 = vmatpush.msra.mxu3 %v1654_v2  ;;  %185 = vmatpush.msrb.mxu2 %v1654_v2  ;;  %v1680_v7 = vld [vmem:[%s2393_s4] sm:$0xff]  ;;  %v72_v39 = vld [vmem:[%s2389_s0 + $0x8] sm:$0xff]  ;;  %s1584_s8 = smov [#allocation12]   ;;  %s1264_s2 = sshll.u32 %s2399_s10, 4  ;;  %s1265_s2 = int_to_ptr.hbm [resolvable:$true] %s1264_s2 }
  0x10   :  { %1288 = vmatmul.msk.f32.vlgmr.msra.gmra.mxu0 %vm84_vm1, %v71_v5  ;;  %384 = vmatpush.msra.mxu1 %v1654_v2  ;;  %v66_v9 = vld [vmem:[%s2390_s1] sm:$0xff]  ;;  %s1580_s1 = smov 32   ;;  %s1262_s20 = sshll.u32 %s1584_s8, 4  ;;  %s1263_s20 = int_to_ptr.vmem [resolvable:$true] %s1262_s20 }
  0x11   :  { %320 = vmatpush.msra.mxu3 %v1659_v3  ;;  %186 = vmatpush.msrb.mxu2 %v1659_v3  ;;  %68 = vst.msk [vmem:[#allocation9] sm:$0xff] %vm2400_vm2, %v66_v9  ;;  %v1715_v12 = vld [vmem:[%s2394_s5] ss:$0 sm:$0xff]  ;;  %s2316_s5 = sshll.u32 %s1583_s9, 4  ;;  %s1585_s23 = smov 128   ;;  %s1242_s5 = int_to_ptr.vmem [resolvable:$true] %s2316_s5 }
  0x12   :  { %385 = vmatpush.msra.mxu1 %v1659_v3  ;;  %s1586_s24 = smov 8  }
  0x13   :  { %321 = vmatpush.msra.mxu3 %v1672_v6  ;;  %187 = vmatpush.msrb.mxu2 %v1672_v6 }
  0x14   :  { %386 = vmatpush.msra.mxu1 %v1672_v6 }
  0x15   :  { %322 = vmatpush.msra.mxu3 %v1680_v7  ;;  %188 = vmatpush.msrb.mxu2 %v1680_v7  ;;  %v167_v8 = vld [vmem:[#allocation10] sm:$0xff] }
  0x16   :  { %387 = vmatpush.msra.mxu1 %v1680_v7  ;;  %1296 = vmatmul.msk.f32.vlgmr.msrb.gmra.mxu2 %vm2400_vm2, %v167_v8 }
  0x17   :  { %514 = vmatpush.msrb.mxu3 %v1654_v2  ;;  %254 = vmatpush.msra.mxu2 %v1654_v2 }
  0x18   :  { %579 = vmatpush.msrb.mxu1 %v1654_v2  ;;  %v166_v17 = vld [vmem:[#allocation9] sm:$0xff]  ;;  %1289 = vmatmul.msk.f32.gmra.mxu0 %vm84_vm1, %v72_v39 }
  0x19   :  { %515 = vmatpush.msrb.mxu3 %v1659_v3  ;;  %255 = vmatpush.msra.mxu2 %v1659_v3 }
  0x1a   :  { %580 = vmatpush.msrb.mxu1 %v1659_v3 }
  0x1b   :  { %516 = vmatpush.msrb.mxu3 %v1672_v6  ;;  %256 = vmatpush.msra.mxu2 %v1672_v6 }
  0x1c   :  { %581 = vmatpush.msrb.mxu1 %v1672_v6 }
  0x1d   :  { %517 = vmatpush.msrb.mxu3 %v1680_v7  ;;  %257 = vmatpush.msra.mxu2 %v1680_v7 }
  0x1e   :  { %582 = vmatpush.msrb.mxu1 %v1680_v7 }
  0x1f   :  { %449 = vmatpush.msrb.mxu2 %v1654_v2 }
  0x21   :  { %450 = vmatpush.msrb.mxu2 %v1659_v3 }
  0x23   :  { %451 = vmatpush.msrb.mxu2 %v1672_v6 }
  0x25   :  { %452 = vmatpush.msrb.mxu2 %v1680_v7 }
  0x8d   :  { %v130_v11 = vpop.f32.mrf.mxu0 }
  0x8e   :  { %v131_v13 = vadd.f32 %v1715_v12, %v130_v11 }
  0x91   :  { %v1710_v10 = vpop.f32.mrf.mxu2 }
  0x95   :  { %v133_v41 = vpop.f32.mrf.mxu0 }
  0x96   :  { %v134_v42 = vadd.f32 %v1715_v12, %v133_v41 }
  0x99   :  { %v190_v14 = vpop.f32.mrf.mxu2 }
  0x9a   :  { %v193_v15 = vadd.f32 %v190_v14, %v131_v13 }
  0x9c   :  { %1337 = vtanh.f32 %v193_v15  ;;  %v1297_v18 = vmul.f32 -1.442695, %v193_v15 }
  0x9e   :  { %1339 = vpow2.f32 %v1297_v18 }
  0xa2   :  { %v1338_v16 = vpop.eup %1337 }
  0xa3   :  { %220 = vrot.lane.b32.xlu0 %v1338_v16, %s1579_s16 }
  0xa4   :  { %v1340_v19 = vpop.eup %1339 }
  0xa5   :  { %v197_v20 = vadd.f32 1.0, %v1340_v19 }
  0xa7   :  { %1341 = vrcp.f32 %v197_v20  ;;  %v209_v26 = vand.u32 2147483648, %v197_v20  ;;  %vm203_vm4 = vweird.f32 %v197_v20  ;;  %v207_v27 = vand.u32 2147483647, %v197_v20 }
  0xa9   :  { %v210_v29 = vor.u32 1.1754944e-38, %v209_v26  ;;  %vm208_vm6 = vcmp.eq.f32.partialorder %v207_v27, 8.507059e+37 }
  0xab   :  { %215 = vrot.lane.b32.xlu0 %v166_v17, %s1580_s1 }
  0xad   :  { %v1342_v21 = vpop.eup %1341 }
  0xae   :  { %v199_v22 = vmul.f32 %v1342_v21, %v197_v20  ;;  %vm204_vm3 = vweird.f32 %v1342_v21 }
  0xaf   :  { %vm205_vm5 = vmor %vm203_vm4, %vm204_vm3 }
  0xb0   :  { %v200_v23 = vsub.f32 1.0, %v199_v22 }
  0xb2   :  { %v201_v24 = vmul.f32 %v1342_v21, %v200_v23 }
  0xb4   :  { %v202_v25 = vadd.f32 %v1342_v21, %v201_v24 }
  0xb6   :  { %v206_v28 = vsel %vm205_vm5, %v1342_v21, %v202_v25 }
  0xb7   :  { %v211_v31 = vsel %vm208_vm6, %v210_v29, %v206_v28  ;;  %v74_v29 = vld [vmem:[%s2389_s0 + $0x18] sm:$0xff] }
 0x115   :  { %v221_v30 = vpop.permute.xlu0 %220 }
 0x116   :  { %v223_v32 = vmul.f32 %v221_v30, %v211_v31 }
 0x118   :  { %225 = vrot.lane.b32.xlu1 %v223_v32, %s1580_s1 }
 0x11d   :  { %v216_v33 = vpop.permute.xlu0 %215 }
 0x11e   :  { %v218_v34 = vmul.f32 %v216_v33, %v211_v31 }
 0x18a   :  { %v226_v35 = vpop.permute.xlu1 %225 }
 0x18b   :  { %v228_v36 = vadd.f32 %v226_v35, %v218_v34 }
 0x18d   :  { %230 = vrot.lane.b32.xlu1 %v228_v36, %s1579_s16 }
 0x1ff   :  { %v231_v37 = vpop.permute.xlu1 %230 }
 0x200   :  { %v233_v38 = vmul.f32 %v231_v37, %v211_v31 }
 0x202   :  { %235 = vrot.lane.b32.xlu2 %v233_v38, %s1580_s1 }
 0x25c   :  { %v236_v40 = vpop.permute.xlu2 %235 }
 0x25d   :  { %238 = vst.msk [vmem:[#allocation3] sm:$0xff] %vm2400_vm2, %v236_v40  ;;  %1298 = vmatmul.msk.f32.vlgmr.msra.gmra.mxu2 %vm2400_vm2, %v236_v40 }
 0x25e   :  { %644 = vmatpush.msra.mxu2 %v1654_v2  ;;  %v73_v2 = vld [vmem:[%s2389_s0 + $0x10] sm:$0xff] }
 0x25f   :  { %1290 = vmatmul.msk.f32.gmra.mxu0 %vm84_vm1, %v73_v2 }
 0x260   :  { %645 = vmatpush.msra.mxu2 %v1659_v3 }
 0x262   :  { %646 = vmatpush.msra.mxu2 %v1672_v6 }
 0x264   :  { %647 = vmatpush.msra.mxu2 %v1680_v7 }
 0x267   :  { %1291 = vmatmul.msk.f32.gmra.mxu0 %vm84_vm1, %v74_v29 }
 0x2dc   :  { %v136_v4 = vpop.f32.mrf.mxu0 }
 0x2dd   :  { %v137_v5 = vadd.f32 %v1715_v12, %v136_v4 }
 0x2e0   :  { %v259_v43 = vpop.f32.mrf.mxu2 }
 0x2e1   :  { %v262_v44 = vadd.f32 %v259_v43, %v134_v42 }
 0x2e3   :  { %1343 = vtanh.f32 %v262_v44  ;;  %v1299_v46 = vmul.f32 -1.442695, %v262_v44 }
 0x2e4   :  { %v139_v33 = vpop.f32.mrf.mxu0 }
 0x2e5   :  { %1345 = vpow2.f32 %v1299_v46  ;;  %v140_v34 = vadd.f32 %v1715_v12, %v139_v33 }
 0x2e9   :  { %v1344_v45 = vpop.eup %1343 }
 0x2ea   :  { %285 = vrot.lane.b32.xlu2 %v1344_v45, %s1579_s16 }
 0x2eb   :  { %v1346_v47 = vpop.eup %1345 }
 0x2ec   :  { %v266_v48 = vadd.f32 1.0, %v1346_v47 }
 0x2ee   :  { %1347 = vrcp.f32 %v266_v48  ;;  %v278_v54 = vand.u32 2147483648, %v266_v48  ;;  %vm272_vm8 = vweird.f32 %v266_v48  ;;  %v276_v55 = vand.u32 2147483647, %v266_v48 }
 0x2f0   :  { %v279_v57 = vor.u32 1.1754944e-38, %v278_v54  ;;  %vm277_vm10 = vcmp.eq.f32.partialorder %v276_v55, 8.507059e+37 }
 0x2f4   :  { %v1348_v49 = vpop.eup %1347 }
 0x2f5   :  { %v268_v50 = vmul.f32 %v1348_v49, %v266_v48  ;;  %vm273_vm7 = vweird.f32 %v1348_v49 }
 0x2f6   :  { %vm274_vm9 = vmor %vm272_vm8, %vm273_vm7 }
 0x2f7   :  { %v269_v51 = vsub.f32 1.0, %v268_v50 }
 0x2f9   :  { %v270_v52 = vmul.f32 %v1348_v49, %v269_v51 }
 0x2fb   :  { %v271_v53 = vadd.f32 %v1348_v49, %v270_v52 }
 0x2fd   :  { %v275_v56 = vsel %vm274_vm9, %v1348_v49, %v271_v53 }
 0x2fe   :  { %v280_v59 = vsel %vm277_vm10, %v279_v57, %v275_v56 }
 0x2ff   :  { %v283_v61 = vmul.f32 %v280_v59, %v228_v36 }
 0x344   :  { %v286_v58 = vpop.permute.xlu2 %285 }
 0x345   :  { %v288_v60 = vmul.f32 %v286_v58, %v280_v59  ;;  %v75_v58 = vld [vmem:[%s2389_s0 + $0x20] sm:$0xff] }
 0x346   :  { %1292 = vmatmul.msk.f32.gmra.mxu0 %vm84_vm1, %v75_v58 }
 0x347   :  { %290 = vrot.lane.b32.xlu0 %v288_v60, %s1580_s1 }
 0x3b9   :  { %v291_v62 = vpop.permute.xlu0 %290 }
 0x3ba   :  { %v293_v63 = vadd.f32 %v291_v62, %v283_v61 }
 0x3bc   :  { %295 = vrot.lane.b32.xlu1 %v293_v63, %s1579_s16 }
 0x3c3   :  { %v142_v60 = vpop.f32.mrf.mxu0 }
 0x3c4   :  { %v143_v61 = vadd.f32 %v1715_v12, %v142_v60 }
 0x42e   :  { %v296_v0 = vpop.permute.xlu1 %295 }
 0x42f   :  { %v298_v1 = vmul.f32 %v296_v0, %v280_v59 }
 0x431   :  { %300 = vrot.lane.b32.xlu2 %v298_v1, %s1580_s1 }
 0x48b   :  { %v301_v3 = vpop.permute.xlu2 %300 }
 0x48c   :  { %303 = vst.msk [vmem:[#allocation3 + $0x8] sm:$0xff] %vm2400_vm2, %v301_v3  ;;  %1300 = vmatmul.msk.f32.vlgmr.msra.gmra.mxu3 %vm2400_vm2, %v301_v3 }
 0x50f   :  { %v324_v6 = vpop.f32.mrf.mxu3 }
 0x510   :  { %v327_v7 = vadd.f32 %v324_v6, %v137_v5 }
 0x512   :  { %1349 = vtanh.f32 %v327_v7  ;;  %v1301_v9 = vmul.f32 -1.442695, %v327_v7 }
 0x514   :  { %1351 = vpow2.f32 %v1301_v9 }
 0x518   :  { %v1350_v8 = vpop.eup %1349 }
 0x519   :  { %350 = vrot.lane.b32.xlu0 %v1350_v8, %s1579_s16 }
 0x51a   :  { %v1352_v11 = vpop.eup %1351 }
 0x51b   :  { %v331_v13 = vadd.f32 1.0, %v1352_v11 }
 0x51d   :  { %1353 = vrcp.f32 %v331_v13  ;;  %v343_v19 = vand.u32 2147483648, %v331_v13  ;;  %vm337_vm12 = vweird.f32 %v331_v13  ;;  %v341_v20 = vand.u32 2147483647, %v331_v13 }
 0x51f   :  { %v344_v22 = vor.u32 1.1754944e-38, %v343_v19  ;;  %vm342_vm14 = vcmp.eq.f32.partialorder %v341_v20, 8.507059e+37 }
 0x523   :  { %v1354_v14 = vpop.eup %1353 }
 0x524   :  { %v333_v15 = vmul.f32 %v1354_v14, %v331_v13  ;;  %vm338_vm11 = vweird.f32 %v1354_v14 }
 0x525   :  { %vm339_vm13 = vmor %vm337_vm12, %vm338_vm11 }
 0x526   :  { %v334_v16 = vsub.f32 1.0, %v333_v15 }
 0x528   :  { %v335_v17 = vmul.f32 %v1354_v14, %v334_v16 }
 0x52a   :  { %v336_v18 = vadd.f32 %v1354_v14, %v335_v17 }
 0x52c   :  { %v340_v21 = vsel %vm339_vm13, %v1354_v14, %v336_v18 }
 0x52d   :  { %v345_v24 = vsel %vm342_vm14, %v344_v22, %v340_v21 }
 0x52e   :  { %v348_v26 = vmul.f32 %v345_v24, %v293_v63 }
 0x58b   :  { %v351_v23 = vpop.permute.xlu0 %350 }
 0x58c   :  { %v353_v25 = vmul.f32 %v351_v23, %v345_v24  ;;  %v710_v23 = vld [vmem:[%s2395_s6 + $0x18] sm:$0xff] }
 0x58d   :  { %1321 = vmatpush.msra.mxu3 %v710_v23 }
 0x58e   :  { %355 = vrot.lane.b32.xlu1 %v353_v25, %s1580_s1  ;;  %v76_v25 = vld [vmem:[%s2389_s0 + $0x28] sm:$0xff] }
 0x58f   :  { %1293 = vmatmul.msk.f32.gmra.mxu0 %vm84_vm1, %v76_v25 }
 0x600   :  { %v356_v27 = vpop.permute.xlu1 %355 }
 0x601   :  { %v358_v28 = vadd.f32 %v356_v27, %v348_v26  ;;  %v708_v26 = vld [vmem:[%s2395_s6 + $0x8] sm:$0xff]  ;;  %v707_v27 = vld [vmem:[%s2395_s6] sm:$0xff] }
 0x603   :  { %360 = vrot.lane.b32.xlu2 %v358_v28, %s1579_s16 }
 0x65d   :  { %v361_v30 = vpop.permute.xlu2 %360 }
 0x65e   :  { %v363_v31 = vmul.f32 %v361_v30, %v345_v24  ;;  %v709_v24 = vld [vmem:[%s2395_s6 + $0x10] sm:$0xff]  ;;  %v145_v30 = vpop.f32.mrf.mxu0 }
 0x65f   :  { %1322 = vmatpush.msra.mxu3 %v709_v24 }
 0x660   :  { %365 = vrot.lane.b32.xlu0 %v363_v31, %s1580_s1  ;;  %v146_v31 = vadd.f32 %v1715_v12, %v145_v30 }
 0x661   :  { %1323 = vmatpush.msra.mxu3 %v708_v26 }
 0x663   :  { %1324 = vmatpush.msra.mxu3 %v707_v27 }
 0x6d2   :  { %v366_v32 = vpop.permute.xlu0 %365 }
 0x6d3   :  { %368 = vst.msk [vmem:[#allocation3 + $0x10] sm:$0xff] %vm2400_vm2, %v366_v32  ;;  %1302 = vmatmul.msk.f32.vlgmr.msra.gmra.mxu1 %vm2400_vm2, %v366_v32 }
 0x6d4   :  { %751 = vmatpush.msra.mxu1 %v710_v23 }
 0x6d6   :  { %752 = vmatpush.msra.mxu1 %v709_v24 }
 0x6d8   :  { %753 = vmatpush.msra.mxu1 %v708_v26 }
 0x6da   :  { %754 = vmatpush.msra.mxu1 %v707_v27  ;;  %v701_v60 = vld [vmem:[#allocation3 + $0x10] sm:$0xff]  ;;  %v152_v27 = vadd.f32 %v1715_v12, %v1710_v10 }
 0x750   :  { %v389_v35 = vpop.f32.mrf.mxu1 }
 0x751   :  { %v392_v36 = vadd.f32 %v389_v35, %v140_v34 }
 0x753   :  { %1355 = vtanh.f32 %v392_v36  ;;  %v1303_v38 = vmul.f32 -1.442695, %v392_v36 }
 0x755   :  { %1357 = vpow2.f32 %v1303_v38 }
 0x759   :  { %v1356_v37 = vpop.eup %1355 }
 0x75a   :  { %415 = vrot.lane.b32.xlu1 %v1356_v37, %s1579_s16 }
 0x75b   :  { %v1358_v39 = vpop.eup %1357 }
 0x75c   :  { %v396_v40 = vadd.f32 1.0, %v1358_v39 }
 0x75e   :  { %1359 = vrcp.f32 %v396_v40  ;;  %v408_v46 = vand.u32 2147483648, %v396_v40  ;;  %vm402_vm0 = vweird.f32 %v396_v40  ;;  %v406_v47 = vand.u32 2147483647, %v396_v40 }
 0x760   :  { %v409_v49 = vor.u32 1.1754944e-38, %v408_v46  ;;  %vm407_vm4 = vcmp.eq.f32.partialorder %v406_v47, 8.507059e+37 }
 0x764   :  { %v1360_v41 = vpop.eup %1359 }
 0x765   :  { %v398_v42 = vmul.f32 %v1360_v41, %v396_v40  ;;  %vm403_vm15 = vweird.f32 %v1360_v41 }
 0x766   :  { %vm404_vm3 = vmor %vm402_vm0, %vm403_vm15 }
 0x767   :  { %v399_v43 = vsub.f32 1.0, %v398_v42 }
 0x769   :  { %v400_v44 = vmul.f32 %v1360_v41, %v399_v43 }
 0x76b   :  { %v401_v45 = vadd.f32 %v1360_v41, %v400_v44 }
 0x76d   :  { %v405_v48 = vsel %vm404_vm3, %v1360_v41, %v401_v45 }
 0x76e   :  { %v410_v51 = vsel %vm407_vm4, %v409_v49, %v405_v48 }
 0x76f   :  { %v413_v53 = vmul.f32 %v410_v51, %v358_v28 }
 0x7cc   :  { %v416_v50 = vpop.permute.xlu1 %415 }
 0x7cd   :  { %v418_v52 = vmul.f32 %v416_v50, %v410_v51 }
 0x7cf   :  { %420 = vrot.lane.b32.xlu2 %v418_v52, %s1580_s1 }
 0x829   :  { %v421_v54 = vpop.permute.xlu2 %420 }
 0x82a   :  { %v423_v55 = vadd.f32 %v421_v54, %v413_v53  ;;  %v77_v53 = vld [vmem:[%s2389_s0 + $0x30] sm:$0xff] }
 0x82b   :  { %1294 = vmatmul.msk.f32.gmra.mxu0 %vm84_vm1, %v77_v53 }
 0x82c   :  { %425 = vrot.lane.b32.xlu0 %v423_v55, %s1579_s16 }
 0x89e   :  { %v426_v56 = vpop.permute.xlu0 %425 }
 0x89f   :  { %v428_v57 = vmul.f32 %v426_v56, %v410_v51 }
 0x8a1   :  { %430 = vrot.lane.b32.xlu1 %v428_v57, %s1580_s1  ;;  %v699_v57 = vld [vmem:[#allocation3] sm:$0xff] }
 0x913   :  { %v431_v59 = vpop.permute.xlu1 %430 }
 0x914   :  { %433 = vst.msk [vmem:[#allocation3 + $0x18] sm:$0xff] %vm2400_vm2, %v431_v59  ;;  %1304 = vmatmul.msk.f32.vlgmr.msrb.gmra.mxu2 %vm2400_vm2, %v431_v59  ;;  %v700_v59 = vld [vmem:[#allocation3 + $0x8] sm:$0xff] }
 0x997   :  { %v454_v62 = vpop.f32.mrf.mxu2 }
 0x998   :  { %v457_v63 = vadd.f32 %v454_v62, %v143_v61  ;;  %v702_v61 = vld [vmem:[#allocation3 + $0x18] sm:$0xff]  ;;  %v148_v62 = vpop.f32.mrf.mxu0 }
 0x99a   :  { %1361 = vtanh.f32 %v457_v63  ;;  %v1305_v1 = vmul.f32 -1.442695, %v457_v63  ;;  %v149_v63 = vadd.f32 %v1715_v12, %v148_v62 }
 0x99c   :  { %1363 = vpow2.f32 %v1305_v1 }
 0x9a0   :  { %v1362_v0 = vpop.eup %1361 }
 0x9a1   :  { %480 = vrot.lane.b32.xlu2 %v1362_v0, %s1579_s16 }
 0x9a2   :  { %v1364_v2 = vpop.eup %1363 }
 0x9a3   :  { %v461_v3 = vadd.f32 1.0, %v1364_v2 }
 0x9a5   :  { %1365 = vrcp.f32 %v461_v3  ;;  %v473_v9 = vand.u32 2147483648, %v461_v3  ;;  %vm467_vm6 = vweird.f32 %v461_v3  ;;  %v471_v11 = vand.u32 2147483647, %v461_v3 }
 0x9a7   :  { %v474_v14 = vor.u32 1.1754944e-38, %v473_v9  ;;  %vm472_vm8 = vcmp.eq.f32.partialorder %v471_v11, 8.507059e+37 }
 0x9ab   :  { %v1366_v4 = vpop.eup %1365 }
 0x9ac   :  { %v463_v5 = vmul.f32 %v1366_v4, %v461_v3  ;;  %vm468_vm5 = vweird.f32 %v1366_v4 }
 0x9ad   :  { %vm469_vm7 = vmor %vm467_vm6, %vm468_vm5 }
 0x9ae   :  { %v464_v6 = vsub.f32 1.0, %v463_v5 }
 0x9b0   :  { %v465_v7 = vmul.f32 %v1366_v4, %v464_v6 }
 0x9b2   :  { %v466_v8 = vadd.f32 %v1366_v4, %v465_v7 }
 0x9b4   :  { %v470_v13 = vsel %vm469_vm7, %v1366_v4, %v466_v8 }
 0x9b5   :  { %v475_v16 = vsel %vm472_vm8, %v474_v14, %v470_v13 }
 0x9b6   :  { %v478_v18 = vmul.f32 %v475_v16, %v423_v55 }
 0x9fb   :  { %v481_v15 = vpop.permute.xlu2 %480 }
 0x9fc   :  { %v483_v17 = vmul.f32 %v481_v15, %v475_v16 }
 0x9fe   :  { %485 = vrot.lane.b32.xlu0 %v483_v17, %s1580_s1 }
 0xa70   :  { %v486_v19 = vpop.permute.xlu0 %485 }
 0xa71   :  { %v488_v20 = vadd.f32 %v486_v19, %v478_v18 }
 0xa73   :  { %490 = vrot.lane.b32.xlu1 %v488_v20, %s1579_s16 }
 0xae5   :  { %v491_v21 = vpop.permute.xlu1 %490 }
 0xae6   :  { %v493_v22 = vmul.f32 %v491_v21, %v475_v16 }
 0xae8   :  { %495 = vrot.lane.b32.xlu2 %v493_v22, %s1580_s1 }
 0xb42   :  { %v496_v28 = vpop.permute.xlu2 %495 }
 0xb43   :  { %498 = vst.msk [vmem:[#allocation3 + $0x20] sm:$0xff] %vm2400_vm2, %v496_v28  ;;  %1306 = vmatmul.msk.f32.vlgmr.msrb.gmra.mxu3 %vm2400_vm2, %v496_v28 }
 0xb4a   :  { %v703_v29 = vld [vmem:[#allocation3 + $0x20] sm:$0xff] }
 0xb4b   :  { %1316 = vmatmul.msk.f32.vlgmr.msra.gmra.mxu3 %vm2400_vm2, %v703_v29 }
 0xbc6   :  { %v519_v32 = vpop.f32.mrf.mxu3 }
 0xbc7   :  { %v522_v33 = vadd.f32 %v519_v32, %v146_v31 }
 0xbc9   :  { %1367 = vtanh.f32 %v522_v33  ;;  %v1307_v35 = vmul.f32 -1.442695, %v522_v33 }
 0xbcb   :  { %1369 = vpow2.f32 %v1307_v35 }
 0xbcf   :  { %v1368_v34 = vpop.eup %1367 }
 0xbd0   :  { %545 = vrot.lane.b32.xlu0 %v1368_v34, %s1579_s16 }
 0xbd1   :  { %v1370_v36 = vpop.eup %1369 }
 0xbd2   :  { %v526_v37 = vadd.f32 1.0, %v1370_v36 }
 0xbd4   :  { %1371 = vrcp.f32 %v526_v37  ;;  %v538_v43 = vand.u32 2147483648, %v526_v37  ;;  %vm532_vm10 = vweird.f32 %v526_v37  ;;  %v536_v44 = vand.u32 2147483647, %v526_v37 }
 0xbd6   :  { %v539_v46 = vor.u32 1.1754944e-38, %v538_v43  ;;  %vm537_vm12 = vcmp.eq.f32.partialorder %v536_v44, 8.507059e+37  ;;  %v780_v44 = vlaneseq }
 0xbda   :  { %v1372_v38 = vpop.eup %1371 }
 0xbdb   :  { %v528_v39 = vmul.f32 %v1372_v38, %v526_v37  ;;  %vm533_vm9 = vweird.f32 %v1372_v38 }
 0xbdc   :  { %vm534_vm11 = vmor %vm532_vm10, %vm533_vm9 }
 0xbdd   :  { %v529_v40 = vsub.f32 1.0, %v528_v39 }
 0xbdf   :  { %v530_v41 = vmul.f32 %v1372_v38, %v529_v40 }
 0xbe1   :  { %v531_v42 = vadd.f32 %v1372_v38, %v530_v41 }
 0xbe3   :  { %v535_v45 = vsel %vm534_vm11, %v1372_v38, %v531_v42 }
 0xbe4   :  { %v540_v48 = vsel %vm537_vm12, %v539_v46, %v535_v45  ;;  %v1818_v46 = vand.u32 127, %v780_v44 }
 0xbe5   :  { %v543_v50 = vmul.f32 %v540_v48, %v488_v20 }
 0xbe6   :  { %vm791_vm6 = vcmp.ge.s32.totalorder %v1818_v46, 48  ;;  %vm792_vm7 = vcmp.lt.s32.totalorder %v1818_v46, 51  ;;  %vm788_vm9 = vcmp.ge.s32.totalorder %v1818_v46, 40  ;;  %vm789_vm10 = vcmp.lt.s32.totalorder %v1818_v46, 48 }
 0xbe7   :  { %vm1830_vm8 = vmand %vm791_vm6, %vm792_vm7 }
 0xbe8   :  { %vm1848_vm11 = vmand %vm788_vm9, %vm789_vm10  ;;  %vm785_vm9 = vcmp.ge.s32.totalorder %v1818_v46, 32  ;;  %vm786_vm10 = vcmp.lt.s32.totalorder %v1818_v46, 40 }
 0xc42   :  { %v546_v47 = vpop.permute.xlu0 %545 }
 0xc43   :  { %v548_v49 = vmul.f32 %v546_v47, %v540_v48  ;;  %v1823_v47 = vld [vmem:[%s2396_s7] ss:$0 sm:$0xff]  ;;  %s1581_s7 = smov 96  }
 0xc45   :  { %550 = vrot.lane.b32.xlu1 %v548_v49, %s1580_s1 }
 0xcb7   :  { %v551_v51 = vpop.permute.xlu1 %550 }
 0xcb8   :  { %v553_v52 = vadd.f32 %v551_v51, %v543_v50 }
 0xcba   :  { %555 = vrot.lane.b32.xlu2 %v553_v52, %s1579_s16 }
 0xd14   :  { %v556_v54 = vpop.permute.xlu2 %555 }
 0xd15   :  { %v558_v55 = vmul.f32 %v556_v54, %v540_v48 }
 0xd17   :  { %560 = vrot.lane.b32.xlu0 %v558_v55, %s1580_s1 }
 0xd89   :  { %v561_v56 = vpop.permute.xlu0 %560 }
 0xd8a   :  { %563 = vst.msk [vmem:[#allocation3 + $0x28] sm:$0xff] %vm2400_vm2, %v561_v56  ;;  %1308 = vmatmul.msk.f32.vlgmr.msrb.gmra.mxu1 %vm2400_vm2, %v561_v56 }
 0xd91   :  { %v704_v58 = vld [vmem:[#allocation3 + $0x28] sm:$0xff] }
 0xd92   :  { %1312 = vmatmul.msk.f32.vlgmr.msra.gmra.mxu1 %vm2400_vm2, %v699_v57  ;;  %1317 = vmatmul.msk.f32.gmra.mxu3 %vm2400_vm2, %v704_v58 }
 0xd9a   :  { %1313 = vmatmul.msk.f32.gmra.mxu1 %vm2400_vm2, %v700_v59 }
 0xda2   :  { %1314 = vmatmul.msk.f32.gmra.mxu1 %vm2400_vm2, %v701_v60 }
 0xdaa   :  { %1315 = vmatmul.msk.f32.gmra.mxu1 %vm2400_vm2, %v702_v61 }
 0xe07   :  { %v584_v0 = vpop.f32.mrf.mxu1 }
 0xe08   :  { %v587_v1 = vadd.f32 %v584_v0, %v149_v63 }
 0xe0a   :  { %1373 = vtanh.f32 %v587_v1  ;;  %v1309_v3 = vmul.f32 -1.442695, %v587_v1 }
 0xe0c   :  { %1375 = vpow2.f32 %v1309_v3 }
 0xe0f   :  { %v756_v45 = vpop.f32.mrf.mxu1 }
 0xe10   :  { %v1374_v2 = vpop.eup %1373  ;;  %v1826_v48 = vadd.f32 %v1823_v47, %v756_v45 }
 0xe11   :  { %610 = vrot.lane.b32.xlu1 %v1374_v2, %s1579_s16 }
 0xe12   :  { %v1376_v4 = vpop.eup %1375  ;;  %v820_v51 = vsel %vm1830_vm8, %v1826_v48, -1e+30  ;;  %v796_v3 = vsel %vm1848_vm11, %v1826_v48, -1e+30 }
 0xe13   :  { %v591_v5 = vadd.f32 1.0, %v1376_v4 }
 0xe15   :  { %1377 = vrcp.f32 %v591_v5  ;;  %v603_v13 = vand.u32 2147483648, %v591_v5  ;;  %vm597_vm13 = vweird.f32 %v591_v5  ;;  %v601_v14 = vand.u32 2147483647, %v591_v5 }
 0xe17   :  { %v604_v16 = vor.u32 1.1754944e-38, %v603_v13  ;;  %vm602_vm15 = vcmp.eq.f32.partialorder %v601_v14, 8.507059e+37  ;;  %v759_v49 = vpop.f32.mrf.mxu1 }
 0xe18   :  { %v1860_v62 = vadd.f32 %v1823_v47, %v759_v49 }
 0xe1a   :  { %v821_v63 = vsel %vm1830_vm8, %v1860_v62, -1e+30 }
 0xe1b   :  { %v1378_v6 = vpop.eup %1377 }
 0xe1c   :  { %v593_v7 = vmul.f32 %v1378_v6, %v591_v5  ;;  %vm598_vm1 = vweird.f32 %v1378_v6 }
 0xe1d   :  { %vm599_vm14 = vmor %vm597_vm13, %vm598_vm1 }
 0xe1e   :  { %v594_v8 = vsub.f32 1.0, %v593_v7 }
 0xe1f   :  { %v762_v55 = vpop.f32.mrf.mxu1 }
 0xe20   :  { %v595_v9 = vmul.f32 %v1378_v6, %v594_v8  ;;  %v1844_v56 = vadd.f32 %v1823_v47, %v762_v55 }
 0xe22   :  { %v596_v11 = vadd.f32 %v1378_v6, %v595_v9  ;;  %v798_v58 = vsel %vm1848_vm11, %v1844_v56, -1e+30  ;;  %v822_v14 = vsel %vm1830_vm8, %v1844_v56, -1e+30 }
 0xe24   :  { %v600_v15 = vsel %vm599_vm14, %v1378_v6, %v596_v11 }
 0xe25   :  { %v605_v18 = vsel %vm602_vm15, %v604_v16, %v600_v15 }
 0xe26   :  { %v608_v20 = vmul.f32 %v605_v18, %v553_v52  ;;  %v768_v52 = vpop.f32.mrf.mxu3 }
 0xe27   :  { %v1838_v53 = vadd.f32 %v1823_v47, %v768_v52  ;;  %v765_v4 = vpop.f32.mrf.mxu1 }
 0xe28   :  { %v1875_v5 = vadd.f32 %v1823_v47, %v765_v4 }
 0xe29   :  { %v824_v54 = vsel %vm1830_vm8, %v1838_v53, -1e+30 }
 0xe2a   :  { %v799_v6 = vsel %vm1848_vm11, %v1875_v5, -1e+30  ;;  %v823_v15 = vsel %vm1830_vm8, %v1875_v5, -1e+30 }
 0xe2e   :  { %v771_v0 = vpop.f32.mrf.mxu3 }
 0xe2f   :  { %v1866_v1 = vadd.f32 %v1823_v47, %v771_v0 }
 0xe31   :  { %v825_v2 = vsel %vm1830_vm8, %v1866_v1, -1e+30 }
 0xe83   :  { %v611_v17 = vpop.permute.xlu1 %610 }
 0xe84   :  { %v613_v19 = vmul.f32 %v611_v17, %v605_v18  ;;  %v797_v17 = vsel %vm1848_vm11, %v1860_v62, -1e+30 }
 0xe86   :  { %615 = vrot.lane.b32.xlu2 %v613_v19, %s1580_s1 }
 0xee0   :  { %v616_v21 = vpop.permute.xlu2 %615 }
 0xee1   :  { %v618_v22 = vadd.f32 %v616_v21, %v608_v20 }
 0xee3   :  { %620 = vrot.lane.b32.xlu0 %v618_v22, %s1579_s16 }
 0xf55   :  { %v621_v23 = vpop.permute.xlu0 %620 }
 0xf56   :  { %v623_v24 = vmul.f32 %v621_v23, %v605_v18  ;;  %v800_v18 = vsel %vm1848_vm11, %v1838_v53, -1e+30 }
 0xf58   :  { %625 = vrot.lane.b32.xlu1 %v623_v24, %s1580_s1 }
 0xfca   :  { %v626_v25 = vpop.permute.xlu1 %625 }
 0xfcb   :  { %628 = vst.msk [vmem:[#allocation3 + $0x30] sm:$0xff] %vm2400_vm2, %v626_v25  ;;  %1310 = vmatmul.msk.f32.vlgmr.msra.gmra.mxu2 %vm2400_vm2, %v626_v25 }
 0xfd2   :  { %v705_v26 = vld [vmem:[#allocation3 + $0x30] sm:$0xff] }
 0xfd3   :  { %1318 = vmatmul.msk.f32.gmra.mxu3 %vm2400_vm2, %v705_v26 }
0x104e   :  { %v649_v28 = vpop.f32.mrf.mxu2 }
0x104f   :  { %v652_v29 = vadd.f32 %v649_v28, %v152_v27 }
0x1051   :  { %1379 = vtanh.f32 %v652_v29  ;;  %v1311_v31 = vmul.f32 -1.442695, %v652_v29 }
0x1053   :  { %1381 = vpow2.f32 %v1311_v31 }
0x1056   :  { %v774_v7 = vpop.f32.mrf.mxu3 }
0x1057   :  { %v1380_v30 = vpop.eup %1379  ;;  %v1881_v8 = vadd.f32 %v1823_v47, %v774_v7 }
0x1058   :  { %675 = vrot.lane.b32.xlu2 %v1380_v30, %s1579_s16 }
0x1059   :  { %v1382_v32 = vpop.eup %1381  ;;  %v802_v9 = vsel %vm1848_vm11, %v1881_v8, -1e+30  ;;  %v826_v16 = vsel %vm1830_vm8, %v1881_v8, -1e+30 }
0x105a   :  { %v656_v33 = vadd.f32 1.0, %v1382_v32 }
0x105c   :  { %1383 = vrcp.f32 %v656_v33  ;;  %v668_v39 = vand.u32 2147483648, %v656_v33  ;;  %vm662_vm3 = vweird.f32 %v656_v33  ;;  %v666_v10 = vand.u32 2147483647, %v656_v33 }
0x105e   :  { %v669_v40 = vor.u32 1.1754944e-38, %v668_v39  ;;  %vm667_vm5 = vcmp.eq.f32.partialorder %v666_v10, 8.507059e+37 }
0x1062   :  { %v1384_v34 = vpop.eup %1383 }
0x1063   :  { %v658_v35 = vmul.f32 %v1384_v34, %v656_v33  ;;  %vm663_vm0 = vweird.f32 %v1384_v34 }
0x1064   :  { %vm664_vm4 = vmor %vm662_vm3, %vm663_vm0  ;;  %vm782_vm0 = vcmp.ge.s32.totalorder %v1818_v46, 16  ;;  %vm783_vm3 = vcmp.lt.s32.totalorder %v1818_v46, 32 }
0x1065   :  { %v659_v36 = vsub.f32 1.0, %v658_v35  ;;  %vm2026_vm7 = vmand %vm782_vm0, %vm783_vm3 }
0x1067   :  { %v660_v37 = vmul.f32 %v1384_v34, %v659_v36 }
0x1069   :  { %v661_v38 = vadd.f32 %v1384_v34, %v660_v37 }
0x106b   :  { %v665_v12 = vsel %vm664_vm4, %v1384_v34, %v661_v38 }
0x106c   :  { %v670_v42 = vsel %vm667_vm5, %v669_v40, %v665_v12 }
0x106d   :  { %v673_v59 = vmul.f32 %v670_v42, %v618_v22 }
0x10b2   :  { %v676_v41 = vpop.permute.xlu2 %675 }
0x10b3   :  { %v678_v43 = vmul.f32 %v676_v41, %v670_v42 }
0x10b5   :  { %680 = vrot.lane.b32.xlu0 %v678_v43, %s1580_s1 }
0x10df   :  { %828 = vmax.xlane.f32.xlu0 %v820_v51 }
0x10e7   :  { %836 = vmax.xlane.f32.xlu0 %v824_v54 }
0x10ef   :  { %808 = vmax.xlane.f32.xlu0 %v798_v58 }
0x1127   :  { %v681_v60 = vpop.permute.xlu0 %680 }
0x1128   :  { %v1855_v61 = vadd.f32 %v681_v60, %v673_v59 }
0x112a   :  { %685 = vrot.lane.b32.xlu1 %v1855_v61, %s1579_s16  ;;  %s1582_s16 = smov [#allocation10]  }
0x1152   :  { %v829_v23 = vpop.xlane.xlu0 %828 }
0x1153   :  { %v844_v52 = vsel %vm1830_vm8, %v829_v23, 0.0 }
0x1154   :  { %830 = vmax.xlane.f32.xlu1 %v821_v63 }
0x115a   :  { %v837_v26 = vpop.xlane.xlu0 %836 }
0x115b   :  { %v848_v33 = vsel %vm1830_vm8, %v837_v26, 0.0 }
0x115c   :  { %838 = vmax.xlane.f32.xlu1 %v825_v2 }
0x1162   :  { %v809_v34 = vpop.xlane.xlu0 %808 }
0x1164   :  { %804 = vmax.xlane.f32.xlu1 %v796_v3 }
0x116c   :  { %810 = vmax.xlane.f32.xlu1 %v799_v6  ;;  %v801_v6 = vsel %vm1848_vm11, %v1866_v1, -1e+30 }
0x1174   :  { %816 = vmax.xlane.f32.xlu1 %v802_v9 }
0x119c   :  { %v686_v11 = vpop.permute.xlu1 %685 }
0x119d   :  { %v688_v13 = vmul.f32 %v686_v11, %v670_v42 }
0x119f   :  { %690 = vrot.lane.b32.xlu2 %v688_v13, %s1580_s1  ;;  %s1252_s1 = sshll.u32 %s1582_s16, 4  ;;  %s1253_s1 = int_to_ptr.vmem [resolvable:$true] %s1252_s1 }
0x11c7   :  { %v831_v25 = vpop.xlane.xlu1 %830 }
0x11c8   :  { %832 = vmax.xlane.f32.xlu2 %v822_v14  ;;  %v845_v27 = vsel %vm1830_vm8, %v831_v25, 0.0 }
0x11cf   :  { %v839_v49 = vpop.xlane.xlu1 %838 }
0x11d0   :  { %834 = vmax.xlane.f32.xlu2 %v823_v15 }
0x11d7   :  { %v805_v51 = vpop.xlane.xlu1 %804 }
0x11d8   :  { %840 = vmax.xlane.f32.xlu2 %v826_v16  ;;  %v852_v54 = vsel %vm1848_vm11, %v805_v51, %v844_v52 }
0x11d9   :  { %v860_v59 = vsub.f32 %v1826_v48, %v852_v54 }
0x11db   :  { %v868_v3 = vmul.f32 1.442695, %v860_v59 }
0x11df   :  { %v811_v0 = vpop.xlane.xlu1 %810 }
0x11e0   :  { %806 = vmax.xlane.f32.xlu2 %v797_v17 }
0x11e7   :  { %v817_v11 = vpop.xlane.xlu1 %816 }
0x11e8   :  { %812 = vmax.xlane.f32.xlu2 %v800_v18 }
0x11f9   :  { %v691_v19 = vpop.permute.xlu2 %690 }
0x11fa   :  { %693 = vst.msk [vmem:[#allocation3 + $0x38] sm:$0xff] %vm2400_vm2, %v691_v19 }
0x11fb   :  { %698 = vst.msk [vmem:[#allocation10] sm:$0xff] %vm2400_vm2, %v691_v19 }
0x11fc   :  { %1257 = dma.vmem_to_hbm [thread:$0]  %s1253_s1, 128, %s1255_s15, [#allocation11]  }
0x1201   :  { %v706_v20 = vld [vmem:[#allocation3 + $0x38] sm:$0xff] }
0x1202   :  { %1319 = vmatmul.msk.f32.gmra.mxu3 %vm2400_vm2, %v706_v20 }
0x123b   :  { %v833_v21 = vpop.xlane.xlu2 %832 }
0x123c   :  { %v846_v32 = vsel %vm1830_vm8, %v833_v21, 0.0 }
0x123d   :  { %v854_v36 = vsel %vm1848_vm11, %v809_v34, %v846_v32 }
0x123e   :  { %v862_v10 = vsub.f32 %v1844_v56, %v854_v36 }
0x1240   :  { %v872_v41 = vmul.f32 1.442695, %v862_v10 }
0x1243   :  { %v835_v22 = vpop.xlane.xlu2 %834 }
0x1244   :  { %v847_v2 = vsel %vm1830_vm8, %v835_v22, 0.0 }
0x124b   :  { %v841_v24 = vpop.xlane.xlu2 %840 }
0x124c   :  { %v850_v9 = vsel %vm1830_vm8, %v841_v24, 0.0 }
0x124d   :  { %v858_v14 = vsel %vm1848_vm11, %v817_v11, %v850_v9 }
0x124e   :  { %v866_v16 = vsub.f32 %v1881_v8, %v858_v14 }
0x1250   :  { %v880_v18 = vmul.f32 1.442695, %v866_v16 }
0x1253   :  { %v807_v28 = vpop.xlane.xlu2 %806 }
0x1254   :  { %v853_v29 = vsel %vm1848_vm11, %v807_v28, %v845_v27 }
0x1255   :  { %v861_v30 = vsub.f32 %v1860_v62, %v853_v29 }
0x1257   :  { %v870_v31 = vmul.f32 1.442695, %v861_v30 }
0x1259   :  { %1385 = vpow2.f32 %v870_v31 }
0x125b   :  { %v813_v35 = vpop.xlane.xlu2 %812 }
0x125c   :  { %v856_v37 = vsel %vm1848_vm11, %v813_v35, %v848_v33 }
0x125d   :  { %v864_v38 = vsub.f32 %v1838_v53, %v856_v37 }
0x125f   :  { %v1919_v39 = vpop.eup %1385  ;;  %v876_v12 = vmul.f32 1.442695, %v864_v38  ;;  %v849_v38 = vsel %vm1830_vm8, %v839_v49, 0.0 }
0x1260   :  { %v885_v40 = vsel %vm1848_vm11, %v1919_v39, 0.0  ;;  %v909_v23 = vsel %vm1830_vm8, %v1919_v39, 0.0 }
0x1261   :  { %1387 = vpow2.f32 %v876_v12  ;;  %894 = vadd.xlane.f32.xlu1 %v885_v40 }
0x1262   :  { %1389 = vpow2.f32 %v872_v41 }
0x1263   :  { %1391 = vpow2.f32 %v868_v3 }
0x1267   :  { %v1925_v42 = vpop.eup %1387 }
0x1268   :  { %v888_v43 = vsel %vm1848_vm11, %v1925_v42, 0.0  ;;  %v1930_v44 = vpop.eup %1389  ;;  %v912_v24 = vsel %vm1830_vm8, %v1925_v42, 0.0 }
0x1269   :  { %900 = vadd.xlane.f32.xlu1 %v888_v43  ;;  %v910_v45 = vsel %vm1830_vm8, %v1930_v44, 0.0  ;;  %v886_v7 = vsel %vm1848_vm11, %v1930_v44, 0.0  ;;  %v1964_v15 = vpop.eup %1391 }
0x126a   :  { %v884_v17 = vsel %vm1848_vm11, %v1964_v15, 0.0 }
0x1271   :  { %920 = vadd.xlane.f32.xlu1 %v910_v45 }
0x1285   :  { %v777_v55 = vpop.f32.mrf.mxu3 }
0x1286   :  { %v1940_v58 = vadd.f32 %v1823_v47, %v777_v55  ;;  %v855_v47 = vsel %vm1848_vm11, %v811_v0, %v847_v2 }
0x1287   :  { %v863_v4 = vsub.f32 %v1875_v5, %v855_v47 }
0x1288   :  { %v803_v60 = vsel %vm1848_vm11, %v1940_v58, -1e+30  ;;  %v827_v63 = vsel %vm1830_vm8, %v1940_v58, -1e+30 }
0x1289   :  { %818 = vmax.xlane.f32.xlu2 %v803_v60  ;;  %842 = vmax.xlane.f32.xlu0 %v827_v63  ;;  %v874_v13 = vmul.f32 1.442695, %v863_v4 }
0x128b   :  { %1393 = vpow2.f32 %v874_v13 }
0x128c   :  { %1395 = vpow2.f32 %v880_v18 }
0x1291   :  { %814 = vmax.xlane.f32.xlu0 %v801_v6  ;;  %896 = vadd.xlane.f32.xlu2 %v886_v7  ;;  %v1970_v19 = vpop.eup %1393 }
0x1292   :  { %v887_v20 = vsel %vm1848_vm11, %v1970_v19, 0.0  ;;  %v1975_v21 = vpop.eup %1395 }
0x1293   :  { %v890_v22 = vsel %vm1848_vm11, %v1975_v21, 0.0 }
0x1299   :  { %892 = vadd.xlane.f32.xlu0 %v884_v17 }
0x12a1   :  { %898 = vadd.xlane.f32.xlu0 %v887_v20 }
0x12a9   :  { %904 = vadd.xlane.f32.xlu0 %v890_v22 }
0x12b1   :  { %918 = vadd.xlane.f32.xlu0 %v909_v23 }
0x12b9   :  { %924 = vadd.xlane.f32.xlu0 %v912_v24 }
0x12d4   :  { %v1986_v25 = vpop.xlane.xlu1 %894 }
0x12d5   :  { %v955_v50 = vand.u32 2147483647, %v1986_v25 }
0x12dc   :  { %v1988_v26 = vpop.xlane.xlu1 %900 }
0x12e4   :  { %v921_v27 = vpop.xlane.xlu1 %920 }
0x12e5   :  { %1397 = vrcp.f32 %v921_v27  ;;  %vm1077_vm1 = vweird.f32 %v921_v27  ;;  %v1083_v60 = vand.u32 2147483648, %v921_v27  ;;  %v1081_v2 = vand.u32 2147483647, %v921_v27 }
0x12e7   :  { %v1084_v13 = vor.u32 1.1754944e-38, %v1083_v60  ;;  %vm1082_vm5 = vcmp.eq.f32.partialorder %v1081_v2, 8.507059e+37  ;;  %v957_v2 = vand.u32 2147483648, %v1986_v25 }
0x12eb   :  { %v1398_v31 = vpop.eup %1397 }
0x12ec   :  { %v1073_v34 = vmul.f32 %v1398_v31, %v921_v27  ;;  %vm1078_vm12 = vweird.f32 %v1398_v31  ;;  %v1166_v27 = vsel %vm2026_vm7, %v1930_v44, %v1844_v56 }
0x12ed   :  { %vm2008_vm13 = vmor %vm1077_vm1, %vm1078_vm12 }
0x12ee   :  { %v1074_v10 = vsub.f32 1.0, %v1073_v34  ;;  %vm2043_vm12 = vmor %vm1848_vm11, %vm1830_vm8 }
0x12ef   :  { %vm2048_vm1 = vmand %vm785_vm9, %vm786_vm10  ;;  %vm993_vm10 = vweird.f32 %v1988_v26 }
0x12f0   :  { %v1075_v43 = vmul.f32 %v1398_v31, %v1074_v10  ;;  %v911_v10 = vsel %vm1830_vm8, %v1970_v19, 0.0 }
0x12f2   :  { %v1076_v55 = vadd.f32 %v1398_v31, %v1075_v43 }
0x12f4   :  { %v1080_v6 = vsel %vm2008_vm13, %v1398_v31, %v1076_v55  ;;  %vm795_vm13 = vcmp.ge.s32.totalorder %v1818_v46, 51 }
0x12f5   :  { %v1085_v20 = vsel %vm1082_vm5, %v1084_v13, %v1080_v6  ;;  %vm956_vm5 = vcmp.eq.f32.partialorder %v955_v50, 8.507059e+37 }
0x12fc   :  { %v819_v28 = vpop.xlane.xlu2 %818  ;;  %v843_v29 = vpop.xlane.xlu0 %842 }
0x12fd   :  { %v851_v30 = vsel %vm1830_vm8, %v843_v29, 0.0 }
0x12fe   :  { %v859_v32 = vsel %vm1848_vm11, %v819_v28, %v851_v30 }
0x12ff   :  { %v867_v33 = vsub.f32 %v1940_v58, %v859_v32 }
0x1301   :  { %v882_v35 = vmul.f32 1.442695, %v867_v33  ;;  %v908_v33 = vsel %vm1830_vm8, %v1964_v15, 0.0 }
0x1303   :  { %1399 = vpow2.f32 %v882_v35 }
0x1304   :  { %v897_v36 = vpop.xlane.xlu2 %896  ;;  %v815_v37 = vpop.xlane.xlu0 %814 }
0x1305   :  { %1401 = vrcp.f32 %v897_v36  ;;  %v857_v12 = vsel %vm1848_vm11, %v815_v37, %v849_v38  ;;  %v971_v63 = vand.u32 2147483648, %v897_v36  ;;  %v969_v47 = vand.u32 2147483647, %v897_v36 }
0x1306   :  { %v865_v40 = vsub.f32 %v1866_v1, %v857_v12  ;;  %vm965_vm15 = vweird.f32 %v897_v36 }
0x1307   :  { %v972_v14 = vor.u32 1.1754944e-38, %v971_v63  ;;  %vm970_vm6 = vcmp.eq.f32.partialorder %v969_v47, 8.507059e+37 }
0x1308   :  { %v878_v45 = vmul.f32 1.442695, %v865_v40 }
0x1309   :  { %v2000_v41 = vpop.eup %1399 }
0x130a   :  { %v915_v51 = vsel %vm1830_vm8, %v2000_v41, 0.0  ;;  %1403 = vpow2.f32 %v878_v45  ;;  %v891_v32 = vsel %vm1848_vm11, %v2000_v41, 0.0 }
0x130b   :  { %v1402_v52 = vpop.eup %1401  ;;  %930 = vadd.xlane.f32.xlu0 %v915_v51  ;;  %1405 = vtanh.f32 %v1844_v56 }
0x130c   :  { %v961_v54 = vmul.f32 %v1402_v52, %v897_v36  ;;  %v2005_v49 = vpop.xlane.xlu0 %892  ;;  %vm966_vm14 = vweird.f32 %v1402_v52  ;;  %1407 = vrcp.f32 %v1986_v25 }
0x130d   :  { %vm967_vm4 = vmor %vm965_vm15, %vm966_vm14  ;;  %1409 = vrcp.f32 %v1988_v26  ;;  %vm951_vm15 = vweird.f32 %v1986_v25 }
0x130e   :  { %v962_v59 = vsub.f32 1.0, %v961_v54 }
0x1310   :  { %v963_v3 = vmul.f32 %v1402_v52, %v962_v59  ;;  %v2012_v4 = vpop.eup %1403 }
0x1311   :  { %v889_v9 = vsel %vm1848_vm11, %v2012_v4, 0.0  ;;  %v913_v11 = vsel %vm1830_vm8, %v2012_v4, 0.0  ;;  %v1406_v18 = vpop.eup %1405 }
0x1312   :  { %v964_v7 = vadd.f32 %v1402_v52, %v963_v3  ;;  %902 = vadd.xlane.f32.xlu2 %v889_v9  ;;  %926 = vadd.xlane.f32.xlu1 %v913_v11  ;;  %v1182_v29 = vmul.f32 0.9, %v1406_v18  ;;  %v1408_v37 = vpop.eup %1407  ;;  %v958_v18 = vor.u32 1.1754944e-38, %v957_v2 }
0x1313   :  { %v947_v38 = vmul.f32 %v1408_v37, %v1986_v25  ;;  %v2072_v43 = vpop.eup %1409  ;;  %vm952_vm14 = vweird.f32 %v1408_v37 }
0x1314   :  { %v968_v16 = vsel %vm967_vm4, %v1402_v52, %v964_v7  ;;  %v2024_v17 = vpop.xlane.xlu0 %898  ;;  %v989_v51 = vmul.f32 %v2072_v43, %v1988_v26  ;;  %v914_v52 = vsel %vm1830_vm8, %v1975_v21, 0.0  ;;  %vm2086_vm0 = vmor %vm951_vm15, %vm952_vm14  ;;  %vm994_vm9 = vweird.f32 %v2072_v43 }
0x1315   :  { %v973_v22 = vsel %vm970_vm6, %v972_v14, %v968_v16  ;;  %v948_v40 = vsub.f32 1.0, %v947_v38  ;;  %vm2115_vm15 = vmor %vm993_vm10, %vm994_vm9 }
0x1316   :  { %v1158_v24 = vsel %vm1848_vm11, %v973_v22, %v1085_v20  ;;  %v990_v63 = vsub.f32 1.0, %v989_v51 }
0x1317   :  { %v1198_v28 = vmul.f32 %v1930_v44, %v1158_v24  ;;  %v1190_v44 = vsel %vm2048_vm1, %v1182_v29, %v1166_v27  ;;  %v949_v45 = vmul.f32 %v1408_v37, %v948_v40 }
0x1318   :  { %v991_v13 = vmul.f32 %v2072_v43, %v990_v63  ;;  %v1168_v63 = vsel %vm2026_vm7, %v1925_v42, %v1838_v53 }
0x1319   :  { %v1206_v56 = vadd.f32 1e-05, %v1198_v28  ;;  %v950_v60 = vadd.f32 %v1408_v37, %v949_v45  ;;  %v1165_v28 = vsel %vm2026_vm7, %v1919_v39, %v1860_v62 }
0x131a   :  { %906 = vadd.xlane.f32.xlu1 %v891_v32  ;;  %916 = vadd.xlane.f32.xlu2 %v908_v33 }
0x131b   :  { %v1214_v34 = vsel %vm2043_vm12, %v1206_v56, %v1190_v44  ;;  %v954_v11 = vsel %vm2086_vm0, %v1408_v37, %v950_v60  ;;  %v992_v56 = vadd.f32 %v2072_v43, %v991_v13 }
0x131c   :  { %v1222_v35 = vsel %vm795_vm13, 0.0, %v1214_v34  ;;  %v2065_v36 = vpop.xlane.xlu0 %904  ;;  %v959_v27 = vsel %vm956_vm5, %v958_v18, %v954_v11 }
0x131d   :  { %1230 = vst [vmem:[#allocation12 + $0x10] sm:$0xff] %v1222_v35 }
0x1322   :  { %922 = vadd.xlane.f32.xlu2 %v911_v10 }
0x1324   :  { %v919_v12 = vpop.xlane.xlu0 %918 }
0x1325   :  { %1411 = vrcp.f32 %v919_v12  ;;  %v1069_v3 = vand.u32 2147483648, %v919_v12  ;;  %v1067_v6 = vand.u32 2147483647, %v919_v12  ;;  %vm1063_vm3 = vweird.f32 %v919_v12 }
0x1326   :  { %1413 = vtanh.f32 %v1860_v62  ;;  %v997_v62 = vand.u32 2147483647, %v1988_v26 }
0x1327   :  { %v1070_v25 = vor.u32 1.1754944e-38, %v1069_v3  ;;  %vm1068_vm6 = vcmp.eq.f32.partialorder %v1067_v6, 8.507059e+37 }
0x132a   :  { %928 = vadd.xlane.f32.xlu2 %v914_v52 }
0x132b   :  { %v1412_v54 = vpop.eup %1411 }
0x132c   :  { %v1059_v55 = vmul.f32 %v1412_v54, %v919_v12  ;;  %v2080_v59 = vpop.xlane.xlu0 %924  ;;  %vm1064_vm8 = vweird.f32 %v1412_v54  ;;  %v1414_v9 = vpop.eup %1413 }
0x132d   :  { %1415 = vrcp.f32 %v2080_v59  ;;  %vm1065_vm4 = vmor %vm1063_vm3, %vm1064_vm8  ;;  %v1181_v24 = vmul.f32 0.9, %v1414_v9  ;;  %v1111_v34 = vand.u32 2147483648, %v2080_v59  ;;  %v1109_v37 = vand.u32 2147483647, %v2080_v59 }
0x132e   :  { %v1060_v0 = vsub.f32 1.0, %v1059_v55  ;;  %1417 = vtanh.f32 %v1838_v53  ;;  %vm1105_vm8 = vweird.f32 %v2080_v59  ;;  %vm998_vm3 = vcmp.eq.f32.partialorder %v997_v62, 8.507059e+37 }
0x132f   :  { %v1189_v12 = vsel %vm2048_vm1, %v1181_v24, %v1165_v28  ;;  %v1112_v52 = vor.u32 1.1754944e-38, %v1111_v34  ;;  %1419 = vrcp.f32 %v2005_v49  ;;  %v943_v34 = vand.u32 2147483648, %v2005_v49 }
0x1330   :  { %v1061_v47 = vmul.f32 %v1412_v54, %v1060_v0  ;;  %1421 = vrcp.f32 %v2024_v17 }
0x1331   :  { %1423 = vtanh.f32 %v1826_v48 }
0x1332   :  { %v1062_v14 = vadd.f32 %v1412_v54, %v1061_v47  ;;  %1425 = vtanh.f32 %v1866_v1 }
0x1333   :  { %v1416_v16 = vpop.eup %1415  ;;  %694 = vrot.lane.b32.xlu1 %v1855_v61, %s1581_s7  ;;  %v999_v61 = vand.u32 2147483648, %v1988_v26  ;;  %v996_v26 = vsel %vm2115_vm15, %v2072_v43, %v992_v56  ;;  %1427 = vtanh.f32 %v1875_v5 }
0x1334   :  { %v1066_v20 = vsel %vm1065_vm4, %v1412_v54, %v1062_v14  ;;  %v1101_v22 = vmul.f32 %v1416_v16, %v2080_v59  ;;  %vm1106_vm14 = vweird.f32 %v1416_v16  ;;  %v1418_v38 = vpop.eup %1417  ;;  %vm1110_vm4 = vcmp.eq.f32.partialorder %v1109_v37, 8.507059e+37 }
0x1335   :  { %v1071_v29 = vsel %vm1068_vm6, %v1070_v25, %v1066_v20  ;;  %v1000_v45 = vor.u32 1.1754944e-38, %v999_v61  ;;  %vm1107_vm0 = vmor %vm1105_vm8, %vm1106_vm14  ;;  %v1184_v2 = vmul.f32 0.9, %v1418_v38  ;;  %v1420_v7 = vpop.eup %1419  ;;  %1429 = vtanh.f32 %v1940_v58 }
0x1336   :  { %v1157_v44 = vsel %vm1848_vm11, %v959_v27, %v1071_v29  ;;  %v1102_v32 = vsub.f32 1.0, %v1101_v22  ;;  %v933_v53 = vmul.f32 %v1420_v7, %v2005_v49  ;;  %1431 = vrcp.f32 %v2065_v36 }
0x1337   :  { %v1197_v33 = vmul.f32 %v1919_v39, %v1157_v44  ;;  %v1001_v43 = vsel %vm998_vm3, %v1000_v45, %v996_v26  ;;  %v1192_v50 = vsel %vm2048_vm1, %v1184_v2, %v1168_v63  ;;  %vm938_vm5 = vweird.f32 %v1420_v7 }
0x1338   :  { %v1103_v35 = vmul.f32 %v1416_v16, %v1102_v32  ;;  %v934_v9 = vsub.f32 1.0, %v933_v53  ;;  %v1164_v44 = vsel %vm2026_vm7, %v1964_v15, %v1826_v48  ;;  %vm937_vm6 = vweird.f32 %v2005_v49 }
0x1339   :  { %v1205_v10 = vadd.f32 1e-05, %v1197_v33  ;;  %v941_v33 = vand.u32 2147483647, %v2005_v49  ;;  %vm2182_vm9 = vmor %vm937_vm6, %vm938_vm5  ;;  %v1167_v49 = vsel %vm2026_vm7, %v1970_v19, %v1875_v5 }
0x133a   :  { %v1104_v40 = vadd.f32 %v1416_v16, %v1103_v35  ;;  %v1169_v35 = vsel %vm2026_vm7, %v2012_v4, %v1866_v1 }
0x133b   :  { %v1213_v51 = vsel %vm2043_vm12, %v1205_v10, %v1189_v12  ;;  %vm942_vm10 = vcmp.eq.f32.partialorder %v941_v33, 8.507059e+37 }
0x133c   :  { %v1221_v54 = vsel %vm795_vm13, 0.0, %v1213_v51  ;;  %v1108_v55 = vsel %vm1107_vm0, %v1416_v16, %v1104_v40  ;;  %v935_v16 = vmul.f32 %v1420_v7, %v934_v9  ;;  %v1171_v40 = vsel %vm2026_vm7, %v2000_v41, %v1940_v58 }
0x133d   :  { %1229 = vst [vmem:[#allocation12 + $0x8] sm:$0xff] %v1221_v54  ;;  %v1113_v60 = vsel %vm1110_vm4, %v1112_v52, %v1108_v55  ;;  %v944_v51 = vor.u32 1.1754944e-38, %v943_v34 }
0x133e   :  { %v1160_v59 = vsel %vm1848_vm11, %v1001_v43, %v1113_v60  ;;  %v936_v56 = vadd.f32 %v1420_v7, %v935_v16  ;;  %v983_v60 = vand.u32 2147483647, %v2024_v17 }
0x133f   :  { %v1200_v0 = vmul.f32 %v1925_v42, %v1160_v59  ;;  %v2148_v42 = vpop.eup %1421  ;;  %v985_v59 = vand.u32 2147483648, %v2024_v17 }
0x1340   :  { %v975_v13 = vmul.f32 %v2148_v42, %v2024_v17  ;;  %v1424_v14 = vpop.eup %1423  ;;  %v940_v26 = vsel %vm2182_vm9, %v1420_v7, %v936_v56 }
0x1341   :  { %v1208_v3 = vadd.f32 1e-05, %v1200_v0  ;;  %v1426_v18 = vpop.eup %1425  ;;  %v1180_v29 = vmul.f32 0.9, %v1424_v14  ;;  %v2222_v0 = vsel %vm942_vm10, %v944_v51, %v940_v26  ;;  %vm980_vm10 = vweird.f32 %v2148_v42 }
0x1342   :  { %v1428_v22 = vpop.eup %1427  ;;  %v976_v27 = vsub.f32 1.0, %v975_v13  ;;  %v1185_v61 = vmul.f32 0.9, %v1426_v18 }
0x1343   :  { %v1216_v47 = vsel %vm2043_vm12, %v1208_v3, %v1192_v50  ;;  %v1430_v24 = vpop.eup %1429  ;;  %v2174_v62 = vmul.f32 0.9, %v1428_v22  ;;  %v2193_v39 = vsel %vm2048_vm1, %v1180_v29, %v1164_v44 }
0x1344   :  { %v1224_v6 = vsel %vm795_vm13, 0.0, %v1216_v47  ;;  %v2164_v28 = vpop.eup %1431  ;;  %v977_v37 = vmul.f32 %v2148_v42, %v976_v27  ;;  %v2199_v10 = vmul.f32 0.9, %v1430_v24  ;;  %v2212_v54 = vsel %vm2048_vm1, %v1185_v61, %v1169_v35 }
0x1345   :  { %1232 = vst [vmem:[#allocation12 + $0x20] sm:$0xff] %v1224_v6  ;;  %v2189_v38 = vmul.f32 %v2164_v28, %v2065_v36 }
0x1346   :  { %v2225_v2 = vadd.f32 %v2148_v42, %v977_v37 }
0x1347   :  { %v1018_v3 = vsub.f32 1.0, %v2189_v38 }
0x1349   :  { %v1019_v58 = vmul.f32 %v2164_v28, %v1018_v3 }
0x137e   :  { %v2151_v11 = vpop.xlane.xlu0 %930 }
0x137f   :  { %1433 = vrcp.f32 %v2151_v11  ;;  %vm1147_vm15 = vweird.f32 %v2151_v11  ;;  %v1151_v22 = vand.u32 2147483647, %v2151_v11  ;;  %v1153_v24 = vand.u32 2147483648, %v2151_v11 }
0x1385   :  { %v2158_v25 = vpop.xlane.xlu2 %902  ;;  %v2160_v20 = vpop.xlane.xlu1 %926 }
0x1386   :  { %1435 = vrcp.f32 %v2158_v25  ;;  %v2170_v32 = vpop.eup %1433  ;;  %v1013_v7 = vand.u32 2147483648, %v2158_v25  ;;  %v1011_v13 = vand.u32 2147483647, %v2158_v25  ;;  %v1125_v14 = vand.u32 2147483648, %v2160_v20 }
0x1387   :  { %1437 = vrcp.f32 %v2160_v20  ;;  %v1143_v12 = vmul.f32 %v2170_v32, %v2151_v11  ;;  %v1123_v18 = vand.u32 2147483647, %v2160_v20  ;;  %vm1007_vm0 = vweird.f32 %v2158_v25 }
0x1388   :  { %1439 = vtanh.f32 %v1881_v8  ;;  %v1014_v44 = vor.u32 1.1754944e-38, %v1013_v7  ;;  %vm1119_vm4 = vweird.f32 %v2160_v20  ;;  %vm1012_vm5 = vcmp.eq.f32.partialorder %v1011_v13, 8.507059e+37 }
0x1389   :  { %v1144_v6 = vsub.f32 1.0, %v1143_v12  ;;  %v1126_v34 = vor.u32 1.1754944e-38, %v1125_v14  ;;  %vm1124_vm9 = vcmp.eq.f32.partialorder %v1123_v18, 8.507059e+37 }
0x138b   :  { %v1145_v56 = vmul.f32 %v2170_v32, %v1144_v6 }
0x138c   :  { %v1436_v1 = vpop.eup %1435 }
0x138d   :  { %v1438_v45 = vpop.eup %1437  ;;  %v1003_v52 = vmul.f32 %v1436_v1, %v2158_v25  ;;  %v2214_v55 = vpop.xlane.xlu2 %916  ;;  %vm1008_vm14 = vweird.f32 %v1436_v1  ;;  %v1195_v25 = vsel %vm2048_vm1, %v2199_v10, %v1171_v40  ;;  %v986_v40 = vor.u32 1.1754944e-38, %v985_v59 }
0x138e   :  { %v2216_v43 = vpop.xlane.xlu1 %906  ;;  %v1115_v63 = vmul.f32 %v1438_v45, %v2160_v20  ;;  %1441 = vrcp.f32 %v2214_v55  ;;  %v2228_v47 = vpop.eup %1439  ;;  %vm1120_vm8 = vweird.f32 %v1438_v45  ;;  %vm1009_vm3 = vmor %vm1007_vm0, %vm1008_vm14  ;;  %vm1148_vm14 = vweird.f32 %v2170_v32 }
0x138f   :  { %v1004_v50 = vsub.f32 1.0, %v1003_v52  ;;  %1443 = vrcp.f32 %v2216_v43  ;;  %vm1121_vm6 = vmor %vm1119_vm4, %vm1120_vm8  ;;  %vm2247_vm0 = vcmp.eq.f32.partialorder %v1151_v22, 8.507059e+37  ;;  %v1146_v52 = vadd.f32 %v2170_v32, %v1145_v56 }
0x1390   :  { %v1116_v53 = vsub.f32 1.0, %v1115_v63  ;;  %v1053_v63 = vand.u32 2147483647, %v2214_v55  ;;  %vm1049_vm4 = vweird.f32 %v2214_v55  ;;  %v1039_v13 = vand.u32 2147483647, %v2216_v43 }
0x1391   :  { %v1005_v9 = vmul.f32 %v1436_v1, %v1004_v50  ;;  %v1055_v50 = vand.u32 2147483648, %v2214_v55  ;;  %v1041_v14 = vand.u32 2147483648, %v2216_v43  ;;  %vm1035_vm8 = vweird.f32 %v2216_v43 }
0x1392   :  { %v1117_v16 = vmul.f32 %v1438_v45, %v1116_v53  ;;  %vm1054_vm2 = vcmp.eq.f32.partialorder %v1053_v63, 8.507059e+37 }
0x1393   :  { %v1006_v27 = vadd.f32 %v1436_v1, %v1005_v9  ;;  %v1154_v9 = vor.u32 1.1754944e-38, %v1153_v24  ;;  %v1056_v24 = vor.u32 1.1754944e-38, %v1055_v50 }
0x1394   :  { %v1442_v29 = vpop.eup %1441  ;;  %v1118_v61 = vadd.f32 %v1438_v45, %v1117_v16 }
0x1395   :  { %v1010_v33 = vsel %vm1009_vm3, %v1436_v1, %v1006_v27  ;;  %v1045_v35 = vmul.f32 %v1442_v29, %v2214_v55  ;;  %v2242_v48 = vpop.xlane.xlu2 %922  ;;  %v1444_v37 = vpop.eup %1443  ;;  %vm1050_vm3 = vweird.f32 %v1442_v29 }
0x1396   :  { %v1015_v26 = vsel %vm1012_vm5, %v1014_v44, %v1010_v33  ;;  %v1122_v12 = vsel %vm1121_vm6, %v1438_v45, %v1118_v61  ;;  %1445 = vrcp.f32 %v2242_v48  ;;  %v1031_v51 = vmul.f32 %v1444_v37, %v2216_v43  ;;  %vm2266_vm5 = vmor %vm1147_vm15, %vm1148_vm14 }
0x1397   :  { %v1127_v20 = vsel %vm1124_vm9, %v1126_v34, %v1122_v12  ;;  %v1046_v1 = vsub.f32 1.0, %v1045_v35  ;;  %vm1036_vm6 = vweird.f32 %v1444_v37  ;;  %v1150_v55 = vsel %vm2266_vm5, %v2170_v32, %v1146_v52  ;;  %vm1051_vm9 = vmor %vm1049_vm4, %vm1050_vm3 }
0x1398   :  { %v1161_v45 = vsel %vm1848_vm11, %v1015_v26, %v1127_v20  ;;  %v1032_v53 = vsub.f32 1.0, %v1031_v51  ;;  %vm1037_vm15 = vmor %vm1035_vm8, %vm1036_vm6  ;;  %v1042_v32 = vor.u32 1.1754944e-38, %v1041_v14  ;;  %vm1040_vm14 = vcmp.eq.f32.partialorder %v1039_v13, 8.507059e+37 }
0x1399   :  { %v1201_v6 = vmul.f32 %v2012_v4, %v1161_v45  ;;  %v1047_v7 = vmul.f32 %v1442_v29, %v1046_v1  ;;  %v1155_v26 = vsel %vm2247_vm0, %v1154_v9, %v1150_v55  ;;  %v1097_v1 = vand.u32 2147483648, %v2242_v48 }
0x139a   :  { %v1033_v22 = vmul.f32 %v1444_v37, %v1032_v53  ;;  %v1095_v45 = vand.u32 2147483647, %v2242_v48  ;;  %vm2423_vm8 = vweird.f32 %v2024_v17  ;;  %vm2303_vm0 = vcmp.eq.f32.partialorder %v983_v60, 8.507059e+37 }
0x139b   :  { %v1209_v18 = vadd.f32 1e-05, %v1201_v6  ;;  %v1048_v4 = vadd.f32 %v1442_v29, %v1047_v7  ;;  %vm2297_vm3 = vmor %vm2423_vm8, %vm980_vm10  ;;  %vm1091_vm10 = vweird.f32 %v2242_v48  ;;  %v1098_v7 = vor.u32 1.1754944e-38, %v1097_v1 }
0x139c   :  { %v1446_v27 = vpop.eup %1445  ;;  %v1034_v44 = vadd.f32 %v1444_v37, %v1033_v22  ;;  %v982_v60 = vsel %vm2297_vm3, %v2148_v42, %v2225_v2  ;;  %vm1096_vm5 = vcmp.eq.f32.partialorder %v1095_v45, 8.507059e+37  ;;  %vm1022_vm6 = vweird.f32 %v2164_v28 }
0x139d   :  { %v1217_v11 = vsel %vm2043_vm12, %v1209_v18, %v2212_v54  ;;  %v1052_v56 = vsel %vm1051_vm9, %v1442_v29, %v1048_v4  ;;  %v1087_v61 = vmul.f32 %v1446_v27, %v2242_v48  ;;  %v2278_v33 = vpop.xlane.xlu2 %928  ;;  %v987_v17 = vsel %vm2303_vm0, %v986_v40, %v982_v60 }
0x139e   :  { %v1225_v34 = vsel %vm795_vm13, 0.0, %v1217_v11  ;;  %v1057_v35 = vsel %vm1054_vm2, %v1056_v24, %v1052_v56  ;;  %1447 = vrcp.f32 %v2278_v33  ;;  %v1038_v54 = vsel %vm1037_vm15, %v1444_v37, %v1034_v44 }
0x139f   :  { %1233 = vst [vmem:[#allocation12 + $0x28] sm:$0xff] %v1225_v34  ;;  %v1156_v43 = vsel %vm1848_vm11, %v2222_v0, %v1057_v35  ;;  %v1088_v29 = vsub.f32 1.0, %v1087_v61  ;;  %v1043_v20 = vsel %vm1040_vm14, %v1042_v32, %v1038_v54  ;;  %vm1092_vm2 = vweird.f32 %v1446_v27 }
0x13a0   :  { %v1196_v12 = vmul.f32 %v1964_v15, %v1156_v43  ;;  %v1163_v51 = vsel %vm1848_vm11, %v1043_v20, %v1155_v26  ;;  %vm1093_vm4 = vmor %vm1091_vm10, %vm1092_vm2  ;;  %v1020_v48 = vadd.f32 %v2164_v28, %v1019_v58  ;;  %vm2428_vm9 = vcmask 261120  }
0x13a1   :  { %v1089_v52 = vmul.f32 %v1446_v27, %v1088_v29  ;;  %v1203_v63 = vmul.f32 %v2000_v41, %v1163_v51  ;;  %vm1021_vm15 = vweird.f32 %v2065_v36  ;;  %v1027_v14 = vand.u32 2147483648, %v2065_v36 }
0x13a2   :  { %v1204_v37 = vadd.f32 1e-05, %v1196_v12  ;;  %v1139_v18 = vand.u32 2147483648, %v2278_v33  ;;  %v1025_v4 = vand.u32 2147483647, %v2065_v36  ;;  %vm1023_vm2 = vmor %vm1021_vm15, %vm1022_vm6  ;;  %v1191_v11 = vsel %vm2048_vm1, %v2174_v62, %v1167_v49 }
0x13a3   :  { %v1090_v10 = vadd.f32 %v1446_v27, %v1089_v52  ;;  %v1211_v6 = vadd.f32 1e-05, %v1203_v63  ;;  %v1024_v24 = vsel %vm1023_vm2, %v2164_v28, %v1020_v48  ;;  %vm1133_vm8 = vweird.f32 %v2278_v33 }
0x13a4   :  { %v1448_v41 = vpop.eup %1447  ;;  %v1212_v50 = vsel %vm2043_vm12, %v1204_v37, %v2193_v39  ;;  %v1028_v56 = vor.u32 1.1754944e-38, %v1027_v14  ;;  %v1140_v61 = vor.u32 1.1754944e-38, %v1139_v18  ;;  %vm1026_vm0 = vcmp.eq.f32.partialorder %v1025_v4, 8.507059e+37 }
0x13a5   :  { %v1220_v42 = vsel %vm795_vm13, 0.0, %v1212_v50  ;;  %v1094_v38 = vsel %vm1093_vm4, %v1446_v27, %v1090_v10  ;;  %v1129_v2 = vmul.f32 %v1448_v41, %v2278_v33  ;;  %v695_v3 = vpop.permute.xlu1 %694  ;;  %v1219_v39 = vsel %vm2043_vm12, %v1211_v6, %v1195_v25 }
0x13a6   :  { %1228 = vst [vmem:[#allocation12] sm:$0xff] %v1220_v42  ;;  %v1099_v59 = vsel %vm1096_vm5, %v1098_v7, %v1094_v38  ;;  %v1227_v53 = vsel %vm795_vm13, 0.0, %v1219_v39  ;;  %vm1134_vm14 = vweird.f32 %v1448_v41  ;;  %v1137_v27 = vand.u32 2147483647, %v2278_v33 }
0x13a7   :  { %v1159_v9 = vsel %vm1848_vm11, %v987_v17, %v1099_v59  ;;  %v1130_v13 = vsub.f32 1.0, %v1129_v2  ;;  %697 = vst.msk [vmem:[#allocation9] sm:$0xff] %vm2428_vm9, %v695_v3  ;;  %vm1135_vm3 = vmor %vm1133_vm8, %vm1134_vm14  ;;  %v1029_v5 = vsel %vm1026_vm0, %v1028_v56, %v1024_v24  ;;  %v1170_v49 = vsel %vm2026_vm7, %v1975_v21, %v1881_v8 }
0x13a8   :  { %1235 = vst [vmem:[#allocation12 + $0x38] sm:$0xff] %v1227_v53  ;;  %v1199_v16 = vmul.f32 %v1970_v19, %v1159_v9  ;;  %1246 = dma.vmem_to_hbm [thread:$0]  %s1242_s5, 128, %s1244_s19, [#allocation6]   ;;  %vm1138_vm10 = vcmp.eq.f32.partialorder %v1137_v27, 8.507059e+37  ;;  %v1186_v35 = vmul.f32 0.9, %v2228_v47 }
0x13a9   :  { %v1131_v22 = vmul.f32 %v1448_v41, %v1130_v13 }
0x13aa   :  { %v1207_v55 = vadd.f32 1e-05, %v1199_v16  ;;  %v1194_v57 = vsel %vm2048_vm1, %v1186_v35, %v1170_v49 }
0x13ab   :  { %v1132_v36 = vadd.f32 %v1448_v41, %v1131_v22 }
0x13ac   :  { %v1215_v44 = vsel %vm2043_vm12, %v1207_v55, %v1191_v11 }
0x13ad   :  { %v1223_v28 = vsel %vm795_vm13, 0.0, %v1215_v44  ;;  %v1136_v34 = vsel %vm1135_vm3, %v1448_v41, %v1132_v36 }
0x13ae   :  { %1231 = vst [vmem:[#allocation12 + $0x18] sm:$0xff] %v1223_v28  ;;  %v1141_v19 = vsel %vm1138_vm10, %v1140_v61, %v1136_v34 }
0x13af   :  { %v1162_v62 = vsel %vm1848_vm11, %v1029_v5, %v1141_v19 }
0x13b0   :  { %v1202_v33 = vmul.f32 %v1975_v21, %v1162_v62 }
0x13b2   :  { %v1210_v32 = vadd.f32 1e-05, %v1202_v33 }
0x13b4   :  { %v1218_v23 = vsel %vm2043_vm12, %v1210_v32, %v1194_v57 }
0x13b5   :  { %v1226_v8 = vsel %vm795_vm13, 0.0, %v1218_v23 }
0x13b6   :  { %1234 = vst [vmem:[#allocation12 + $0x30] sm:$0xff] %v1226_v8 }
0x13b7   :  { %1270 = dma.vmem_to_hbm [thread:$0]  %s1263_s20, 1024, %s1265_s2, [#allocation11], %s1585_s23, %s1585_s23, %s1586_s24  }
0x13b8   :  { %1573 = dma.done.wait [#allocation6], 128  }
0x13b9   :  { %1574 = vsyncadd [#allocation6], 4294967168 }
0x13ba   :  { %1575 = dma.done.wait [#allocation11], 1152  }
0x13bb   :  { %1576 = vsyncadd [#allocation11], 4294966144 }
0x13bc   :  { %1283 = vsyncpa [#allocation5], 1 }
0x13bd   :  { %1284 = vsyncpa [#allocation8], 1 }
0x13be   :  { %1285 = vsyncpa [#allocation6], 1 }
0x13bf   :  { %1286 = vsyncpa [#allocation11], 1 }

</bundles_post_ra>
